<compile_context>
chip_gen: v7x
topology: tpu7x:2x2x1
jax: 0.10.0
libtpu: 0.0.40
codegen_flags: <defaults>
</compile_context>

<pallas_src>
import functools

import jax
import jax.numpy as jnp
from jax import lax
from jax.experimental import pallas as pl
from jax.experimental.pallas import tpu as pltpu


# ----------------------------------------------------------------------------
# Pallas kernel: AFA + shared MLP + ReLU + max-pool over the local group
# ----------------------------------------------------------------------------
def _sa_kernel(x_ref, wa1_ref, ba1_ref, wa2_ref, ba2_ref,
               w1_ref, b1_ref, w2_ref, b2_ref, o_ref, *, apply_afa=True):
    # x_ref: (1, S, Cin, TILE_P) bf16        o_ref: (1, Cout, TILE_P) f32
    s_count = x_ref.shape[1]

    # Small, grid-resident weights: load once per step (hoisted out of the loop).
    wa1 = wa1_ref[...]
    wa2 = wa2_ref[...]
    w1 = w1_ref[...]
    w2 = w2_ref[...]
    ba1 = ba1_ref[...]
    ba2 = ba2_ref[...]
    b1 = b1_ref[...]
    b2 = b2_ref[...]

    pooled = None
    # Static unrolled loop over the (small) nsample axis.  Each slice
    # x_ref[0, s] is a contiguous (Cin, TILE_P) slab: Cin on sublanes,
    # TILE_P on lanes -> no relayout, lane-dense matmuls.
    for s in range(s_count):
        xs = x_ref[0, s, :, :]                                    # (Cin, TILE_P) bf16

        if apply_afa:  # static: mirrors `if new_features.shape[2] != 1:` (npoint > 1)
            # TODO(synk): simplified point-wise AFA (2-layer MLP + residual); the
            #             reference PointWeb AFA uses pairwise feature-difference
            #             impact maps across the group.
            h = jnp.maximum(
                jnp.dot(wa1, xs, preferred_element_type=jnp.float32) + ba1, 0.0)
            adj = jnp.dot(wa2, h.astype(jnp.bfloat16),
                          preferred_element_type=jnp.float32) + ba2
            xs = (xs.astype(jnp.float32) + adj).astype(jnp.bfloat16)  # residual in f32

        # Shared MLP (1x1 Conv2d equivalents) + ReLU.
        # TODO(synk): BatchNorm of the reference SharedMLP is assumed folded into
        #             w*/b* (eval mode); fold scale/shift before calling.
        h1 = jnp.maximum(
            jnp.dot(w1, xs, preferred_element_type=jnp.float32) + b1, 0.0)
        h2 = jnp.maximum(
            jnp.dot(w2, h1.astype(jnp.bfloat16),
                    preferred_element_type=jnp.float32) + b2, 0.0)   # (Cout, TILE_P)

        # F.max_pool2d(kernel_size=[1, nsample]) == running max over s (VPU only).
        pooled = h2 if pooled is None else jnp.maximum(pooled, h2)

    # Output already (B, Cout, P): lane-dense in TILE_P, no in-kernel transpose.
    o_ref[0] = pooled.astype(o_ref.dtype)


# ----------------------------------------------------------------------------
# Tiling / VMEM sizing helpers (generation aware)
# ----------------------------------------------------------------------------
def _round_up(x, m):
    return ((x + m - 1) // m) * m


def _vmem_capacity_bytes():
    try:
        return int(pltpu.get_tpu_info().vmem_capacity_bytes)
    except Exception:
        # Fall back to the smallest per-TC VMEM (v7x) so sizing stays safe.
        return 64 * 1024 * 1024


def _choose_tile_p(P, B, S, Cin, Cafa, C1, Cout, budget_bytes):
    """Largest lane-dense point tile whose per-step working set fits the budget."""
    bytes_per_p = (
        2 * 2 * S * _round_up(Cin, 16)            # double-buffered bf16 input block
        + 4 * (Cafa + 2 * Cin + C1 + 2 * Cout)    # live f32 temporaries per s-step
        + 2 * 4 * Cout)                           # double-buffered f32 output block
    t = max(budget_bytes // max(bytes_per_p, 1), 128)
    t = min((t // 128) * 128, 2048)               # lane-dense multiple of 128, bounded
    if t >= P:
        if B == 1 and P >= 256:
            # Keep >= 2 grid steps so both v7x TensorCores get work.
            return _round_up(-(-P // 2), 128)
        return P                                  # full axis (P may be < 128)
    return t


# ----------------------------------------------------------------------------
# Wrapper: fused AFA + shared MLP + max-pool over (B, S, Cin, P) regions
# ----------------------------------------------------------------------------
def pointweb_sa_mlp(grouped, params, *, apply_afa=True, tile_p=None):
    """grouped: (B, S, Cin, P) channels-first local regions -> (B, Cout, P)."""
    B, S, Cin, P = grouped.shape
    wa1, ba1, wa2, ba2, w1, b1, w2, b2 = params
    Cafa, C1, Cout = wa1.shape[1], w1.shape[1], w2.shape[1]

    vmem_cap = _vmem_capacity_bytes()
    vmem_limit = int(vmem_cap * 0.72)             # ~46 MiB on v7x, ~92 MiB on v5e/v6e
    if tile_p is None:
        tile_p = _choose_tile_p(P, B, S, Cin, Cafa, C1, Cout, vmem_limit // 2)

    # Pad the point axis so the grid tiles it exactly; padded columns sliced off.
    P_pad = _round_up(P, tile_p)
    if P_pad != P:
        grouped = jnp.pad(grouped, ((0, 0), (0, 0), (0, 0), (0, P_pad - P)))

    # bf16 matmul operands (MXU rate, half the HBM traffic for the big tensor);
    # biases stay f32 so all elementwise math stays f32 (v5e has no bf16 VPU).
    # Weights pre-transposed once so every matmul is W^T @ X -> (C, TILE_P).
    # TODO(synk): for production channel widths, zero-pad K/N weight dims to
    #             multiples of 128 for better MXU fill (not worth it at toy sizes).
    grouped = grouped.astype(jnp.bfloat16)
    wa1t, wa2t, w1t, w2t = (jnp.transpose(w).astype(jnp.bfloat16)
                            for w in (wa1, wa2, w1, w2))
    ba1c, ba2c, b1c, b2c = (jnp.reshape(b, (-1, 1)).astype(jnp.float32)
                            for b in (ba1, ba2, b1, b2))

    def full_spec(arr):
        nd = arr.ndim
        return pl.BlockSpec(arr.shape, lambda b, p, _nd=nd: (0,) * _nd)

    out = pl.pallas_call(
        functools.partial(_sa_kernel, apply_afa=apply_afa),
        out_shape=jax.ShapeDtypeStruct((B, Cout, P_pad), jnp.float32),
        grid=(B, P_pad // tile_p),
        in_specs=[
            pl.BlockSpec((1, S, Cin, tile_p), lambda b, p: (b, 0, 0, p)),
            full_spec(wa1t), full_spec(ba1c), full_spec(wa2t), full_spec(ba2c),
            full_spec(w1t), full_spec(b1c), full_spec(w2t), full_spec(b2c),
        ],
        out_specs=pl.BlockSpec((1, Cout, tile_p), lambda b, p: (b, 0, p)),
        compiler_params=pltpu.CompilerParams(
            dimension_semantics=("parallel", "parallel"),
            vmem_limit_bytes=vmem_limit),
    )(grouped, wa1t, ba1c, wa2t, ba2c, w1t, b1c, w2t, b2c)

    return out[:, :, :P] if P_pad != P else out


# ----------------------------------------------------------------------------
# Plain-JAX glue: FPS sampling + grouping (data-dependent gathers)
# ----------------------------------------------------------------------------
def furthest_point_sampling(xyz, npoint):
    """xyz: (B, N, 3) -> (B, npoint) int32 indices (pointops.furthestsampling).
    TODO(synk): strictly sequential O(npoint*N); dominates at large npoint/N."""
    B, N, _ = xyz.shape

    def body(i, state):
        dists, idxs, farthest = state
        idxs = idxs.at[:, i].set(farthest)
        centroid = jnp.take_along_axis(xyz, farthest[:, None, None], axis=1)  # (B,1,3)
        d = jnp.sum((xyz - centroid) ** 2, axis=-1)                            # (B,N)
        dists = jnp.minimum(dists, d)
        farthest = jnp.argmax(dists, axis=-1).astype(jnp.int32)
        return dists, idxs, farthest

    dists = jnp.full((B, N), 1e10, dtype=xyz.dtype)
    idxs = jnp.zeros((B, npoint), dtype=jnp.int32)
    farthest = jnp.zeros((B,), dtype=jnp.int32)
    _, idxs, _ = lax.fori_loop(0, npoint, body, (dists, idxs, farthest))
    return idxs


def knn_group_cf(xyz, new_xyz, features, nsample):
    """kNN grouping, channels-first output (B, nsample, 3 + C, P).

    xyz: (B, N, 3), new_xyz: (B, P, 3), features: (B, C, N).
    TODO(synk): kNN stands in for the reference ball-query (QueryAndGroup)
    grouper; the (B,P,N) distance matrix + top_k should be blocked / fused into
    the kernel (scalar-prefetched indices) for realistic N.
    """
    B, N, _ = xyz.shape
    C = features.shape[1]
    d2 = jnp.sum((new_xyz[:, :, None, :] - xyz[:, None, :, :]) ** 2, axis=-1)  # (B,P,N)
    _, idx = lax.top_k(-d2, nsample)                                           # (B,P,S)
    idx_t = jnp.transpose(idx, (0, 2, 1))                                      # (B,S,P)

    b_idx = jnp.arange(B)[:, None, None, None]
    n_idx = idx_t[:, :, None, :]                                               # (B,S,1,P)
    xyz_cf = jnp.transpose(xyz, (0, 2, 1))                                     # (B,3,N)
    grouped_xyz = xyz_cf[b_idx, jnp.arange(3)[None, None, :, None], n_idx]     # (B,S,3,P)
    grouped_feats = features[b_idx, jnp.arange(C)[None, None, :, None], n_idx]  # (B,S,C,P)

    new_xyz_cf = jnp.transpose(new_xyz, (0, 2, 1))                             # (B,3,P)
    rel_xyz = grouped_xyz - new_xyz_cf[:, None, :, :]
    return jnp.concatenate([rel_xyz, grouped_feats], axis=2)                   # (B,S,3+C,P)


# ----------------------------------------------------------------------------
# Full forward pass (matches _PointWebSAModuleBase.forward semantics)
# ----------------------------------------------------------------------------
def pointweb_sa_forward(xyz, features, params, npoint, nsample):
    # TODO(synk): npoint=None (group-all) branch of the reference is not implemented.
    B = xyz.shape[0]
    fps_idx = furthest_point_sampling(xyz, npoint)                 # (B, npoint)
    batch = jnp.arange(B)[:, None]
    new_xyz = xyz[batch, fps_idx]                                  # (B, npoint, 3)

    grouped = knn_group_cf(xyz, new_xyz, features, nsample)        # (B, S, 3+C, P)

    apply_afa = npoint != 1                                        # static shape check
    # torch.cat([new_features], dim=1): single branch, output (B, Cout, npoint)
    new_features = pointweb_sa_mlp(grouped, params, apply_afa=apply_afa)
    return new_xyz, new_features


if __name__ == "__main__":
    key = jax.random.PRNGKey(0)
    B, N, C = 2, 16, 5          # batch, points, feature channels
    npoint, nsample = 8, 8
    Cin = 3 + C                 # grouper concatenates relative xyz with features
    C1, C2 = 16, 32             # shared-MLP hidden / output channels
    Cafa = 2 * Cin              # AFA hidden width

    keys = jax.random.split(key, 8)
    xyz = jax.random.normal(keys[0], (B, N, 3), jnp.float32)
    features = jax.random.normal(keys[1], (B, C, N), jnp.float32)

    scale = 0.1
    wa1 = scale * jax.random.normal(keys[2], (Cin, Cafa), jnp.float32)
    ba1 = jnp.zeros((Cafa,), jnp.float32)
    wa2 = scale * jax.random.normal(keys[3], (Cafa, Cin), jnp.float32)
    ba2 = jnp.zeros((Cin,), jnp.float32)
    w1 = scale * jax.random.normal(keys[4], (Cin, C1), jnp.float32)
    b1 = jnp.zeros((C1,), jnp.float32)
    w2 = scale * jax.random.normal(keys[5], (C1, C2), jnp.float32)
    b2 = jnp.zeros((C2,), jnp.float32)
    params = (wa1, ba1, wa2, ba2, w1, b1, w2, b2)

    new_xyz, new_features = jax.jit(
        functools.partial(pointweb_sa_forward, npoint=npoint, nsample=nsample)
    )(xyz, features, params)
    jax.block_until_ready((new_xyz, new_features))

    assert new_xyz.shape == (B, npoint, 3), new_xyz.shape
    assert new_features.shape == (B, C2, npoint), new_features.shape
    assert bool(jnp.all(jnp.isfinite(new_features)))
    print("KERNEL_OK")
</pallas_src>

<mosaic_0001>
module attributes {stable_mosaic.version = 11 : i64} {
  func.func @_sa_kernel(%arg0: i32, %arg1: i32, %arg2: memref<1x8x8x8xbf16, #tpu.memory_space<vmem>>, %arg3: memref<16x8xbf16, #tpu.memory_space<vmem>>, %arg4: memref<16x1xf32, #tpu.memory_space<vmem>>, %arg5: memref<8x16xbf16, #tpu.memory_space<vmem>>, %arg6: memref<8x1xf32, #tpu.memory_space<vmem>>, %arg7: memref<16x8xbf16, #tpu.memory_space<vmem>>, %arg8: memref<16x1xf32, #tpu.memory_space<vmem>>, %arg9: memref<32x16xbf16, #tpu.memory_space<vmem>>, %arg10: memref<32x1xf32, #tpu.memory_space<vmem>>, %arg11: memref<1x32x8xf32, #tpu.memory_space<vmem>>) attributes {dimension_semantics = [#tpu.dimension_semantics<parallel>, #tpu.dimension_semantics<parallel>], iteration_bounds = array<i64: 2, 1>, scalar_prefetch = 0 : i64, scratch_operands = 0 : i64, tpu.core_type = #tpu.core_type<tc>, window_params = [{transform_indices = @transform_0, window_bounds = array<i64: 1, 8, 8, 8>}, {pipeline_mode = #tpu.pipeline_mode<synchronous>, transform_indices = @transform_1, window_bounds = array<i64: 16, 8>}, {pipeline_mode = #tpu.pipeline_mode<synchronous>, transform_indices = @transform_2, window_bounds = array<i64: 16, 1>}, {pipeline_mode = #tpu.pipeline_mode<synchronous>, transform_indices = @transform_3, window_bounds = array<i64: 8, 16>}, {pipeline_mode = #tpu.pipeline_mode<synchronous>, transform_indices = @transform_4, window_bounds = array<i64: 8, 1>}, {pipeline_mode = #tpu.pipeline_mode<synchronous>, transform_indices = @transform_5, window_bounds = array<i64: 16, 8>}, {pipeline_mode = #tpu.pipeline_mode<synchronous>, transform_indices = @transform_6, window_bounds = array<i64: 16, 1>}, {pipeline_mode = #tpu.pipeline_mode<synchronous>, transform_indices = @transform_7, window_bounds = array<i64: 32, 16>}, {pipeline_mode = #tpu.pipeline_mode<synchronous>, transform_indices = @transform_8, window_bounds = array<i64: 32, 1>}, {transform_indices = @transform_9, window_bounds = array<i64: 1, 32, 8>}]} {
    %c0 = arith.constant 0 : index
    %c0_0 = arith.constant 0 : index
    %0 = vector.load %arg3[%c0, %c0_0] : memref<16x8xbf16, #tpu.memory_space<vmem>>, vector<16x8xbf16>
    %c0_1 = arith.constant 0 : index
    %c0_2 = arith.constant 0 : index
    %1 = vector.load %arg5[%c0_1, %c0_2] : memref<8x16xbf16, #tpu.memory_space<vmem>>, vector<8x16xbf16>
    %c0_3 = arith.constant 0 : index
    %c0_4 = arith.constant 0 : index
    %2 = vector.load %arg7[%c0_3, %c0_4] : memref<16x8xbf16, #tpu.memory_space<vmem>>, vector<16x8xbf16>
    %c0_5 = arith.constant 0 : index
    %c0_6 = arith.constant 0 : index
    %3 = vector.load %arg9[%c0_5, %c0_6] : memref<32x16xbf16, #tpu.memory_space<vmem>>, vector<32x16xbf16>
    %c0_7 = arith.constant 0 : index
    %c0_8 = arith.constant 0 : index
    %4 = vector.load %arg4[%c0_7, %c0_8] : memref<16x1xf32, #tpu.memory_space<vmem>>, vector<16x1xf32>
    %c0_9 = arith.constant 0 : index
    %c0_10 = arith.constant 0 : index
    %5 = vector.load %arg6[%c0_9, %c0_10] : memref<8x1xf32, #tpu.memory_space<vmem>>, vector<8x1xf32>
    %c0_11 = arith.constant 0 : index
    %c0_12 = arith.constant 0 : index
    %6 = vector.load %arg8[%c0_11, %c0_12] : memref<16x1xf32, #tpu.memory_space<vmem>>, vector<16x1xf32>
    %c0_13 = arith.constant 0 : index
    %c0_14 = arith.constant 0 : index
    %7 = vector.load %arg10[%c0_13, %c0_14] : memref<32x1xf32, #tpu.memory_space<vmem>>, vector<32x1xf32>
    %c0_15 = arith.constant 0 : index
    %c0_16 = arith.constant 0 : index
    %c0_17 = arith.constant 0 : index
    %c0_18 = arith.constant 0 : index
    %8 = vector.load %arg2[%c0_15, %c0_16, %c0_17, %c0_18] : memref<1x8x8x8xbf16, #tpu.memory_space<vmem>>, vector<1x1x8x8xbf16>
    %9 = vector.shape_cast %8 : vector<1x1x8x8xbf16> to vector<8x8xbf16>
    %cst = arith.constant dense<0.000000e+00> : vector<16x8xf32>
    %10 = tpu.matmul %0, %9, %cst {dimension_numbers = #tpu.dot_dimension_numbers<[1], [0], [0], [1], [0, 0, 1, 1], [], []>} : vector<16x8xbf16>, vector<8x8xbf16>, vector<16x8xf32> -> vector<16x8xf32>
    %11 = vector.broadcast %4 : vector<16x1xf32> to vector<16x8xf32>
    %12 = arith.addf %10, %11 : vector<16x8xf32>
    %cst_19 = arith.constant 0.000000e+00 : f32
    %13 = vector.broadcast %cst_19 : f32 to vector<16x8xf32>
    %14 = arith.maximumf %12, %13 : vector<16x8xf32>
    %15 = arith.truncf %14 : vector<16x8xf32> to vector<16x8xbf16>
    %cst_20 = arith.constant dense<0.000000e+00> : vector<8x8xf32>
    %16 = tpu.matmul %1, %15, %cst_20 {dimension_numbers = #tpu.dot_dimension_numbers<[1], [0], [0], [1], [0, 0, 1, 1], [], []>} : vector<8x16xbf16>, vector<16x8xbf16>, vector<8x8xf32> -> vector<8x8xf32>
    %17 = vector.broadcast %5 : vector<8x1xf32> to vector<8x8xf32>
    %18 = arith.addf %16, %17 : vector<8x8xf32>
    %19 = arith.extf %9 : vector<8x8xbf16> to vector<8x8xf32>
    %20 = arith.addf %19, %18 : vector<8x8xf32>
    %21 = arith.truncf %20 : vector<8x8xf32> to vector<8x8xbf16>
    %cst_21 = arith.constant dense<0.000000e+00> : vector<16x8xf32>
    %22 = tpu.matmul %2, %21, %cst_21 {dimension_numbers = #tpu.dot_dimension_numbers<[1], [0], [0], [1], [0, 0, 1, 1], [], []>} : vector<16x8xbf16>, vector<8x8xbf16>, vector<16x8xf32> -> vector<16x8xf32>
    %23 = vector.broadcast %6 : vector<16x1xf32> to vector<16x8xf32>
    %24 = arith.addf %22, %23 : vector<16x8xf32>
    %cst_22 = arith.constant 0.000000e+00 : f32
    %25 = vector.broadcast %cst_22 : f32 to vector<16x8xf32>
    %26 = arith.maximumf %24, %25 : vector<16x8xf32>
    %27 = arith.truncf %26 : vector<16x8xf32> to vector<16x8xbf16>
    %cst_23 = arith.constant dense<0.000000e+00> : vector<32x8xf32>
    %28 = tpu.matmul %3, %27, %cst_23 {dimension_numbers = #tpu.dot_dimension_numbers<[1], [0], [0], [1], [0, 0, 1, 1], [], []>} : vector<32x16xbf16>, vector<16x8xbf16>, vector<32x8xf32> -> vector<32x8xf32>
    %29 = vector.broadcast %7 : vector<32x1xf32> to vector<32x8xf32>
    %30 = arith.addf %28, %29 : vector<32x8xf32>
    %cst_24 = arith.constant 0.000000e+00 : f32
    %31 = vector.broadcast %cst_24 : f32 to vector<32x8xf32>
    %32 = arith.maximumf %30, %31 : vector<32x8xf32>
    %c0_25 = arith.constant 0 : index
    %c1 = arith.constant 1 : index
    %c0_26 = arith.constant 0 : index
    %c0_27 = arith.constant 0 : index
    %33 = vector.load %arg2[%c0_25, %c1, %c0_26, %c0_27] : memref<1x8x8x8xbf16, #tpu.memory_space<vmem>>, vector<1x1x8x8xbf16>
    %34 = vector.shape_cast %33 : vector<1x1x8x8xbf16> to vector<8x8xbf16>
    %cst_28 = arith.constant dense<0.000000e+00> : vector<16x8xf32>
    %35 = tpu.matmul %0, %34, %cst_28 {dimension_numbers = #tpu.dot_dimension_numbers<[1], [0], [0], [1], [0, 0, 1, 1], [], []>} : vector<16x8xbf16>, vector<8x8xbf16>, vector<16x8xf32> -> vector<16x8xf32>
    %36 = vector.broadcast %4 : vector<16x1xf32> to vector<16x8xf32>
    %37 = arith.addf %35, %36 : vector<16x8xf32>
    %cst_29 = arith.constant 0.000000e+00 : f32
    %38 = vector.broadcast %cst_29 : f32 to vector<16x8xf32>
    %39 = arith.maximumf %37, %38 : vector<16x8xf32>
    %40 = arith.truncf %39 : vector<16x8xf32> to vector<16x8xbf16>
    %cst_30 = arith.constant dense<0.000000e+00> : vector<8x8xf32>
    %41 = tpu.matmul %1, %40, %cst_30 {dimension_numbers = #tpu.dot_dimension_numbers<[1], [0], [0], [1], [0, 0, 1, 1], [], []>} : vector<8x16xbf16>, vector<16x8xbf16>, vector<8x8xf32> -> vector<8x8xf32>
    %42 = vector.broadcast %5 : vector<8x1xf32> to vector<8x8xf32>
    %43 = arith.addf %41, %42 : vector<8x8xf32>
    %44 = arith.extf %34 : vector<8x8xbf16> to vector<8x8xf32>
    %45 = arith.addf %44, %43 : vector<8x8xf32>
    %46 = arith.truncf %45 : vector<8x8xf32> to vector<8x8xbf16>
    %cst_31 = arith.constant dense<0.000000e+00> : vector<16x8xf32>
    %47 = tpu.matmul %2, %46, %cst_31 {dimension_numbers = #tpu.dot_dimension_numbers<[1], [0], [0], [1], [0, 0, 1, 1], [], []>} : vector<16x8xbf16>, vector<8x8xbf16>, vector<16x8xf32> -> vector<16x8xf32>
    %48 = vector.broadcast %6 : vector<16x1xf32> to vector<16x8xf32>
    %49 = arith.addf %47, %48 : vector<16x8xf32>
    %cst_32 = arith.constant 0.000000e+00 : f32
    %50 = vector.broadcast %cst_32 : f32 to vector<16x8xf32>
    %51 = arith.maximumf %49, %50 : vector<16x8xf32>
    %52 = arith.truncf %51 : vector<16x8xf32> to vector<16x8xbf16>
    %cst_33 = arith.constant dense<0.000000e+00> : vector<32x8xf32>
    %53 = tpu.matmul %3, %52, %cst_33 {dimension_numbers = #tpu.dot_dimension_numbers<[1], [0], [0], [1], [0, 0, 1, 1], [], []>} : vector<32x16xbf16>, vector<16x8xbf16>, vector<32x8xf32> -> vector<32x8xf32>
    %54 = vector.broadcast %7 : vector<32x1xf32> to vector<32x8xf32>
    %55 = arith.addf %53, %54 : vector<32x8xf32>
    %cst_34 = arith.constant 0.000000e+00 : f32
    %56 = vector.broadcast %cst_34 : f32 to vector<32x8xf32>
    %57 = arith.maximumf %55, %56 : vector<32x8xf32>
    %58 = arith.maximumf %32, %57 : vector<32x8xf32>
    %c0_35 = arith.constant 0 : index
    %c2 = arith.constant 2 : index
    %c0_36 = arith.constant 0 : index
    %c0_37 = arith.constant 0 : index
    %59 = vector.load %arg2[%c0_35, %c2, %c0_36, %c0_37] : memref<1x8x8x8xbf16, #tpu.memory_space<vmem>>, vector<1x1x8x8xbf16>
    %60 = vector.shape_cast %59 : vector<1x1x8x8xbf16> to vector<8x8xbf16>
    %cst_38 = arith.constant dense<0.000000e+00> : vector<16x8xf32>
    %61 = tpu.matmul %0, %60, %cst_38 {dimension_numbers = #tpu.dot_dimension_numbers<[1], [0], [0], [1], [0, 0, 1, 1], [], []>} : vector<16x8xbf16>, vector<8x8xbf16>, vector<16x8xf32> -> vector<16x8xf32>
    %62 = vector.broadcast %4 : vector<16x1xf32> to vector<16x8xf32>
    %63 = arith.addf %61, %62 : vector<16x8xf32>
    %cst_39 = arith.constant 0.000000e+00 : f32
    %64 = vector.broadcast %cst_39 : f32 to vector<16x8xf32>
    %65 = arith.maximumf %63, %64 : vector<16x8xf32>
    %66 = arith.truncf %65 : vector<16x8xf32> to vector<16x8xbf16>
    %cst_40 = arith.constant dense<0.000000e+00> : vector<8x8xf32>
    %67 = tpu.matmul %1, %66, %cst_40 {dimension_numbers = #tpu.dot_dimension_numbers<[1], [0], [0], [1], [0, 0, 1, 1], [], []>} : vector<8x16xbf16>, vector<16x8xbf16>, vector<8x8xf32> -> vector<8x8xf32>
    %68 = vector.broadcast %5 : vector<8x1xf32> to vector<8x8xf32>
    %69 = arith.addf %67, %68 : vector<8x8xf32>
    %70 = arith.extf %60 : vector<8x8xbf16> to vector<8x8xf32>
    %71 = arith.addf %70, %69 : vector<8x8xf32>
    %72 = arith.truncf %71 : vector<8x8xf32> to vector<8x8xbf16>
    %cst_41 = arith.constant dense<0.000000e+00> : vector<16x8xf32>
    %73 = tpu.matmul %2, %72, %cst_41 {dimension_numbers = #tpu.dot_dimension_numbers<[1], [0], [0], [1], [0, 0, 1, 1], [], []>} : vector<16x8xbf16>, vector<8x8xbf16>, vector<16x8xf32> -> vector<16x8xf32>
    %74 = vector.broadcast %6 : vector<16x1xf32> to vector<16x8xf32>
    %75 = arith.addf %73, %74 : vector<16x8xf32>
    %cst_42 = arith.constant 0.000000e+00 : f32
    %76 = vector.broadcast %cst_42 : f32 to vector<16x8xf32>
    %77 = arith.maximumf %75, %76 : vector<16x8xf32>
    %78 = arith.truncf %77 : vector<16x8xf32> to vector<16x8xbf16>
    %cst_43 = arith.constant dense<0.000000e+00> : vector<32x8xf32>
    %79 = tpu.matmul %3, %78, %cst_43 {dimension_numbers = #tpu.dot_dimension_numbers<[1], [0], [0], [1], [0, 0, 1, 1], [], []>} : vector<32x16xbf16>, vector<16x8xbf16>, vector<32x8xf32> -> vector<32x8xf32>
    %80 = vector.broadcast %7 : vector<32x1xf32> to vector<32x8xf32>
    %81 = arith.addf %79, %80 : vector<32x8xf32>
    %cst_44 = arith.constant 0.000000e+00 : f32
    %82 = vector.broadcast %cst_44 : f32 to vector<32x8xf32>
    %83 = arith.maximumf %81, %82 : vector<32x8xf32>
    %84 = arith.maximumf %58, %83 : vector<32x8xf32>
    %c0_45 = arith.constant 0 : index
    %c3 = arith.constant 3 : index
    %c0_46 = arith.constant 0 : index
    %c0_47 = arith.constant 0 : index
    %85 = vector.load %arg2[%c0_45, %c3, %c0_46, %c0_47] : memref<1x8x8x8xbf16, #tpu.memory_space<vmem>>, vector<1x1x8x8xbf16>
    %86 = vector.shape_cast %85 : vector<1x1x8x8xbf16> to vector<8x8xbf16>
    %cst_48 = arith.constant dense<0.000000e+00> : vector<16x8xf32>
    %87 = tpu.matmul %0, %86, %cst_48 {dimension_numbers = #tpu.dot_dimension_numbers<[1], [0], [0], [1], [0, 0, 1, 1], [], []>} : vector<16x8xbf16>, vector<8x8xbf16>, vector<16x8xf32> -> vector<16x8xf32>
    %88 = vector.broadcast %4 : vector<16x1xf32> to vector<16x8xf32>
    %89 = arith.addf %87, %88 : vector<16x8xf32>
    %cst_49 = arith.constant 0.000000e+00 : f32
    %90 = vector.broadcast %cst_49 : f32 to vector<16x8xf32>
    %91 = arith.maximumf %89, %90 : vector<16x8xf32>
    %92 = arith.truncf %91 : vector<16x8xf32> to vector<16x8xbf16>
    %cst_50 = arith.constant dense<0.000000e+00> : vector<8x8xf32>
    %93 = tpu.matmul %1, %92, %cst_50 {dimension_numbers = #tpu.dot_dimension_numbers<[1], [0], [0], [1], [0, 0, 1, 1], [], []>} : vector<8x16xbf16>, vector<16x8xbf16>, vector<8x8xf32> -> vector<8x8xf32>
    %94 = vector.broadcast %5 : vector<8x1xf32> to vector<8x8xf32>
    %95 = arith.addf %93, %94 : vector<8x8xf32>
    %96 = arith.extf %86 : vector<8x8xbf16> to vector<8x8xf32>
    %97 = arith.addf %96, %95 : vector<8x8xf32>
    %98 = arith.truncf %97 : vector<8x8xf32> to vector<8x8xbf16>
    %cst_51 = arith.constant dense<0.000000e+00> : vector<16x8xf32>
    %99 = tpu.matmul %2, %98, %cst_51 {dimension_numbers = #tpu.dot_dimension_numbers<[1], [0], [0], [1], [0, 0, 1, 1], [], []>} : vector<16x8xbf16>, vector<8x8xbf16>, vector<16x8xf32> -> vector<16x8xf32>
    %100 = vector.broadcast %6 : vector<16x1xf32> to vector<16x8xf32>
    %101 = arith.addf %99, %100 : vector<16x8xf32>
    %cst_52 = arith.constant 0.000000e+00 : f32
    %102 = vector.broadcast %cst_52 : f32 to vector<16x8xf32>
    %103 = arith.maximumf %101, %102 : vector<16x8xf32>
    %104 = arith.truncf %103 : vector<16x8xf32> to vector<16x8xbf16>
    %cst_53 = arith.constant dense<0.000000e+00> : vector<32x8xf32>
    %105 = tpu.matmul %3, %104, %cst_53 {dimension_numbers = #tpu.dot_dimension_numbers<[1], [0], [0], [1], [0, 0, 1, 1], [], []>} : vector<32x16xbf16>, vector<16x8xbf16>, vector<32x8xf32> -> vector<32x8xf32>
    %106 = vector.broadcast %7 : vector<32x1xf32> to vector<32x8xf32>
    %107 = arith.addf %105, %106 : vector<32x8xf32>
    %cst_54 = arith.constant 0.000000e+00 : f32
    %108 = vector.broadcast %cst_54 : f32 to vector<32x8xf32>
    %109 = arith.maximumf %107, %108 : vector<32x8xf32>
    %110 = arith.maximumf %84, %109 : vector<32x8xf32>
    %c0_55 = arith.constant 0 : index
    %c4 = arith.constant 4 : index
    %c0_56 = arith.constant 0 : index
    %c0_57 = arith.constant 0 : index
    %111 = vector.load %arg2[%c0_55, %c4, %c0_56, %c0_57] : memref<1x8x8x8xbf16, #tpu.memory_space<vmem>>, vector<1x1x8x8xbf16>
    %112 = vector.shape_cast %111 : vector<1x1x8x8xbf16> to vector<8x8xbf16>
    %cst_58 = arith.constant dense<0.000000e+00> : vector<16x8xf32>
    %113 = tpu.matmul %0, %112, %cst_58 {dimension_numbers = #tpu.dot_dimension_numbers<[1], [0], [0], [1], [0, 0, 1, 1], [], []>} : vector<16x8xbf16>, vector<8x8xbf16>, vector<16x8xf32> -> vector<16x8xf32>
    %114 = vector.broadcast %4 : vector<16x1xf32> to vector<16x8xf32>
    %115 = arith.addf %113, %114 : vector<16x8xf32>
    %cst_59 = arith.constant 0.000000e+00 : f32
    %116 = vector.broadcast %cst_59 : f32 to vector<16x8xf32>
    %117 = arith.maximumf %115, %116 : vector<16x8xf32>
    %118 = arith.truncf %117 : vector<16x8xf32> to vector<16x8xbf16>
    %cst_60 = arith.constant dense<0.000000e+00> : vector<8x8xf32>
    %119 = tpu.matmul %1, %118, %cst_60 {dimension_numbers = #tpu.dot_dimension_numbers<[1], [0], [0], [1], [0, 0, 1, 1], [], []>} : vector<8x16xbf16>, vector<16x8xbf16>, vector<8x8xf32> -> vector<8x8xf32>
    %120 = vector.broadcast %5 : vector<8x1xf32> to vector<8x8xf32>
    %121 = arith.addf %119, %120 : vector<8x8xf32>
    %122 = arith.extf %112 : vector<8x8xbf16> to vector<8x8xf32>
    %123 = arith.addf %122, %121 : vector<8x8xf32>
    %124 = arith.truncf %123 : vector<8x8xf32> to vector<8x8xbf16>
    %cst_61 = arith.constant dense<0.000000e+00> : vector<16x8xf32>
    %125 = tpu.matmul %2, %124, %cst_61 {dimension_numbers = #tpu.dot_dimension_numbers<[1], [0], [0], [1], [0, 0, 1, 1], [], []>} : vector<16x8xbf16>, vector<8x8xbf16>, vector<16x8xf32> -> vector<16x8xf32>
    %126 = vector.broadcast %6 : vector<16x1xf32> to vector<16x8xf32>
    %127 = arith.addf %125, %126 : vector<16x8xf32>
    %cst_62 = arith.constant 0.000000e+00 : f32
    %128 = vector.broadcast %cst_62 : f32 to vector<16x8xf32>
    %129 = arith.maximumf %127, %128 : vector<16x8xf32>
    %130 = arith.truncf %129 : vector<16x8xf32> to vector<16x8xbf16>
    %cst_63 = arith.constant dense<0.000000e+00> : vector<32x8xf32>
    %131 = tpu.matmul %3, %130, %cst_63 {dimension_numbers = #tpu.dot_dimension_numbers<[1], [0], [0], [1], [0, 0, 1, 1], [], []>} : vector<32x16xbf16>, vector<16x8xbf16>, vector<32x8xf32> -> vector<32x8xf32>
    %132 = vector.broadcast %7 : vector<32x1xf32> to vector<32x8xf32>
    %133 = arith.addf %131, %132 : vector<32x8xf32>
    %cst_64 = arith.constant 0.000000e+00 : f32
    %134 = vector.broadcast %cst_64 : f32 to vector<32x8xf32>
    %135 = arith.maximumf %133, %134 : vector<32x8xf32>
    %136 = arith.maximumf %110, %135 : vector<32x8xf32>
    %c0_65 = arith.constant 0 : index
    %c5 = arith.constant 5 : index
    %c0_66 = arith.constant 0 : index
    %c0_67 = arith.constant 0 : index
    %137 = vector.load %arg2[%c0_65, %c5, %c0_66, %c0_67] : memref<1x8x8x8xbf16, #tpu.memory_space<vmem>>, vector<1x1x8x8xbf16>
    %138 = vector.shape_cast %137 : vector<1x1x8x8xbf16> to vector<8x8xbf16>
    %cst_68 = arith.constant dense<0.000000e+00> : vector<16x8xf32>
    %139 = tpu.matmul %0, %138, %cst_68 {dimension_numbers = #tpu.dot_dimension_numbers<[1], [0], [0], [1], [0, 0, 1, 1], [], []>} : vector<16x8xbf16>, vector<8x8xbf16>, vector<16x8xf32> -> vector<16x8xf32>
    %140 = vector.broadcast %4 : vector<16x1xf32> to vector<16x8xf32>
    %141 = arith.addf %139, %140 : vector<16x8xf32>
    %cst_69 = arith.constant 0.000000e+00 : f32
    %142 = vector.broadcast %cst_69 : f32 to vector<16x8xf32>
    %143 = arith.maximumf %141, %142 : vector<16x8xf32>
    %144 = arith.truncf %143 : vector<16x8xf32> to vector<16x8xbf16>
    %cst_70 = arith.constant dense<0.000000e+00> : vector<8x8xf32>
    %145 = tpu.matmul %1, %144, %cst_70 {dimension_numbers = #tpu.dot_dimension_numbers<[1], [0], [0], [1], [0, 0, 1, 1], [], []>} : vector<8x16xbf16>, vector<16x8xbf16>, vector<8x8xf32> -> vector<8x8xf32>
    %146 = vector.broadcast %5 : vector<8x1xf32> to vector<8x8xf32>
    %147 = arith.addf %145, %146 : vector<8x8xf32>
    %148 = arith.extf %138 : vector<8x8xbf16> to vector<8x8xf32>
    %149 = arith.addf %148, %147 : vector<8x8xf32>
    %150 = arith.truncf %149 : vector<8x8xf32> to vector<8x8xbf16>
    %cst_71 = arith.constant dense<0.000000e+00> : vector<16x8xf32>
    %151 = tpu.matmul %2, %150, %cst_71 {dimension_numbers = #tpu.dot_dimension_numbers<[1], [0], [0], [1], [0, 0, 1, 1], [], []>} : vector<16x8xbf16>, vector<8x8xbf16>, vector<16x8xf32> -> vector<16x8xf32>
    %152 = vector.broadcast %6 : vector<16x1xf32> to vector<16x8xf32>
    %153 = arith.addf %151, %152 : vector<16x8xf32>
    %cst_72 = arith.constant 0.000000e+00 : f32
    %154 = vector.broadcast %cst_72 : f32 to vector<16x8xf32>
    %155 = arith.maximumf %153, %154 : vector<16x8xf32>
    %156 = arith.truncf %155 : vector<16x8xf32> to vector<16x8xbf16>
    %cst_73 = arith.constant dense<0.000000e+00> : vector<32x8xf32>
    %157 = tpu.matmul %3, %156, %cst_73 {dimension_numbers = #tpu.dot_dimension_numbers<[1], [0], [0], [1], [0, 0, 1, 1], [], []>} : vector<32x16xbf16>, vector<16x8xbf16>, vector<32x8xf32> -> vector<32x8xf32>
    %158 = vector.broadcast %7 : vector<32x1xf32> to vector<32x8xf32>
    %159 = arith.addf %157, %158 : vector<32x8xf32>
    %cst_74 = arith.constant 0.000000e+00 : f32
    %160 = vector.broadcast %cst_74 : f32 to vector<32x8xf32>
    %161 = arith.maximumf %159, %160 : vector<32x8xf32>
    %162 = arith.maximumf %136, %161 : vector<32x8xf32>
    %c0_75 = arith.constant 0 : index
    %c6 = arith.constant 6 : index
    %c0_76 = arith.constant 0 : index
    %c0_77 = arith.constant 0 : index
    %163 = vector.load %arg2[%c0_75, %c6, %c0_76, %c0_77] : memref<1x8x8x8xbf16, #tpu.memory_space<vmem>>, vector<1x1x8x8xbf16>
    %164 = vector.shape_cast %163 : vector<1x1x8x8xbf16> to vector<8x8xbf16>
    %cst_78 = arith.constant dense<0.000000e+00> : vector<16x8xf32>
    %165 = tpu.matmul %0, %164, %cst_78 {dimension_numbers = #tpu.dot_dimension_numbers<[1], [0], [0], [1], [0, 0, 1, 1], [], []>} : vector<16x8xbf16>, vector<8x8xbf16>, vector<16x8xf32> -> vector<16x8xf32>
    %166 = vector.broadcast %4 : vector<16x1xf32> to vector<16x8xf32>
    %167 = arith.addf %165, %166 : vector<16x8xf32>
    %cst_79 = arith.constant 0.000000e+00 : f32
    %168 = vector.broadcast %cst_79 : f32 to vector<16x8xf32>
    %169 = arith.maximumf %167, %168 : vector<16x8xf32>
    %170 = arith.truncf %169 : vector<16x8xf32> to vector<16x8xbf16>
    %cst_80 = arith.constant dense<0.000000e+00> : vector<8x8xf32>
    %171 = tpu.matmul %1, %170, %cst_80 {dimension_numbers = #tpu.dot_dimension_numbers<[1], [0], [0], [1], [0, 0, 1, 1], [], []>} : vector<8x16xbf16>, vector<16x8xbf16>, vector<8x8xf32> -> vector<8x8xf32>
    %172 = vector.broadcast %5 : vector<8x1xf32> to vector<8x8xf32>
    %173 = arith.addf %171, %172 : vector<8x8xf32>
    %174 = arith.extf %164 : vector<8x8xbf16> to vector<8x8xf32>
    %175 = arith.addf %174, %173 : vector<8x8xf32>
    %176 = arith.truncf %175 : vector<8x8xf32> to vector<8x8xbf16>
    %cst_81 = arith.constant dense<0.000000e+00> : vector<16x8xf32>
    %177 = tpu.matmul %2, %176, %cst_81 {dimension_numbers = #tpu.dot_dimension_numbers<[1], [0], [0], [1], [0, 0, 1, 1], [], []>} : vector<16x8xbf16>, vector<8x8xbf16>, vector<16x8xf32> -> vector<16x8xf32>
    %178 = vector.broadcast %6 : vector<16x1xf32> to vector<16x8xf32>
    %179 = arith.addf %177, %178 : vector<16x8xf32>
    %cst_82 = arith.constant 0.000000e+00 : f32
    %180 = vector.broadcast %cst_82 : f32 to vector<16x8xf32>
    %181 = arith.maximumf %179, %180 : vector<16x8xf32>
    %182 = arith.truncf %181 : vector<16x8xf32> to vector<16x8xbf16>
    %cst_83 = arith.constant dense<0.000000e+00> : vector<32x8xf32>
    %183 = tpu.matmul %3, %182, %cst_83 {dimension_numbers = #tpu.dot_dimension_numbers<[1], [0], [0], [1], [0, 0, 1, 1], [], []>} : vector<32x16xbf16>, vector<16x8xbf16>, vector<32x8xf32> -> vector<32x8xf32>
    %184 = vector.broadcast %7 : vector<32x1xf32> to vector<32x8xf32>
    %185 = arith.addf %183, %184 : vector<32x8xf32>
    %cst_84 = arith.constant 0.000000e+00 : f32
    %186 = vector.broadcast %cst_84 : f32 to vector<32x8xf32>
    %187 = arith.maximumf %185, %186 : vector<32x8xf32>
    %188 = arith.maximumf %162, %187 : vector<32x8xf32>
    %c0_85 = arith.constant 0 : index
    %c7 = arith.constant 7 : index
    %c0_86 = arith.constant 0 : index
    %c0_87 = arith.constant 0 : index
    %189 = vector.load %arg2[%c0_85, %c7, %c0_86, %c0_87] : memref<1x8x8x8xbf16, #tpu.memory_space<vmem>>, vector<1x1x8x8xbf16>
    %190 = vector.shape_cast %189 : vector<1x1x8x8xbf16> to vector<8x8xbf16>
    %cst_88 = arith.constant dense<0.000000e+00> : vector<16x8xf32>
    %191 = tpu.matmul %0, %190, %cst_88 {dimension_numbers = #tpu.dot_dimension_numbers<[1], [0], [0], [1], [0, 0, 1, 1], [], []>} : vector<16x8xbf16>, vector<8x8xbf16>, vector<16x8xf32> -> vector<16x8xf32>
    %192 = vector.broadcast %4 : vector<16x1xf32> to vector<16x8xf32>
    %193 = arith.addf %191, %192 : vector<16x8xf32>
    %cst_89 = arith.constant 0.000000e+00 : f32
    %194 = vector.broadcast %cst_89 : f32 to vector<16x8xf32>
    %195 = arith.maximumf %193, %194 : vector<16x8xf32>
    %196 = arith.truncf %195 : vector<16x8xf32> to vector<16x8xbf16>
    %cst_90 = arith.constant dense<0.000000e+00> : vector<8x8xf32>
    %197 = tpu.matmul %1, %196, %cst_90 {dimension_numbers = #tpu.dot_dimension_numbers<[1], [0], [0], [1], [0, 0, 1, 1], [], []>} : vector<8x16xbf16>, vector<16x8xbf16>, vector<8x8xf32> -> vector<8x8xf32>
    %198 = vector.broadcast %5 : vector<8x1xf32> to vector<8x8xf32>
    %199 = arith.addf %197, %198 : vector<8x8xf32>
    %200 = arith.extf %190 : vector<8x8xbf16> to vector<8x8xf32>
    %201 = arith.addf %200, %199 : vector<8x8xf32>
    %202 = arith.truncf %201 : vector<8x8xf32> to vector<8x8xbf16>
    %cst_91 = arith.constant dense<0.000000e+00> : vector<16x8xf32>
    %203 = tpu.matmul %2, %202, %cst_91 {dimension_numbers = #tpu.dot_dimension_numbers<[1], [0], [0], [1], [0, 0, 1, 1], [], []>} : vector<16x8xbf16>, vector<8x8xbf16>, vector<16x8xf32> -> vector<16x8xf32>
    %204 = vector.broadcast %6 : vector<16x1xf32> to vector<16x8xf32>
    %205 = arith.addf %203, %204 : vector<16x8xf32>
    %cst_92 = arith.constant 0.000000e+00 : f32
    %206 = vector.broadcast %cst_92 : f32 to vector<16x8xf32>
    %207 = arith.maximumf %205, %206 : vector<16x8xf32>
    %208 = arith.truncf %207 : vector<16x8xf32> to vector<16x8xbf16>
    %cst_93 = arith.constant dense<0.000000e+00> : vector<32x8xf32>
    %209 = tpu.matmul %3, %208, %cst_93 {dimension_numbers = #tpu.dot_dimension_numbers<[1], [0], [0], [1], [0, 0, 1, 1], [], []>} : vector<32x16xbf16>, vector<16x8xbf16>, vector<32x8xf32> -> vector<32x8xf32>
    %210 = vector.broadcast %7 : vector<32x1xf32> to vector<32x8xf32>
    %211 = arith.addf %209, %210 : vector<32x8xf32>
    %cst_94 = arith.constant 0.000000e+00 : f32
    %212 = vector.broadcast %cst_94 : f32 to vector<32x8xf32>
    %213 = arith.maximumf %211, %212 : vector<32x8xf32>
    %214 = arith.maximumf %188, %213 : vector<32x8xf32>
    %c0_95 = arith.constant 0 : index
    %c0_96 = arith.constant 0 : index
    %c0_97 = arith.constant 0 : index
    %215 = vector.load %arg11[%c0_95, %c0_96, %c0_97] : memref<1x32x8xf32, #tpu.memory_space<vmem>>, vector<1x32x8xf32>
    %216 = vector.shape_cast %215 : vector<1x32x8xf32> to vector<32x8xf32>
    %217 = vector.shape_cast %214 : vector<32x8xf32> to vector<1x32x8xf32>
    tpu.vector_store %arg11[%c0_95, %c0_96, %c0_97], %217 {strides = array<i32>} : memref<1x32x8xf32, #tpu.memory_space<vmem>>, vector<1x32x8xf32>,
    return
  }
  func.func @transform_0(%arg0: i32, %arg1: i32) -> (i32, i32, i32, i32) {
    %c0_i32 = arith.constant 0 : i32
    %c0_i32_0 = arith.constant 0 : i32
    %c0_i32_1 = arith.constant 0 : i32
    return %arg0, %c0_i32, %c0_i32_0, %arg1 : i32, i32, i32, i32
  }
  func.func @transform_1(%arg0: i32, %arg1: i32) -> (i32, i32) {
    %c0_i32 = arith.constant 0 : i32
    %c0_i32_0 = arith.constant 0 : i32
    %c0_i32_1 = arith.constant 0 : i32
    return %c0_i32, %c0_i32_0 : i32, i32
  }
  func.func @transform_2(%arg0: i32, %arg1: i32) -> (i32, i32) {
    %c0_i32 = arith.constant 0 : i32
    %c0_i32_0 = arith.constant 0 : i32
    %c0_i32_1 = arith.constant 0 : i32
    return %c0_i32, %c0_i32_0 : i32, i32
  }
  func.func @transform_3(%arg0: i32, %arg1: i32) -> (i32, i32) {
    %c0_i32 = arith.constant 0 : i32
    %c0_i32_0 = arith.constant 0 : i32
    %c0_i32_1 = arith.constant 0 : i32
    return %c0_i32, %c0_i32_0 : i32, i32
  }
  func.func @transform_4(%arg0: i32, %arg1: i32) -> (i32, i32) {
    %c0_i32 = arith.constant 0 : i32
    %c0_i32_0 = arith.constant 0 : i32
    %c0_i32_1 = arith.constant 0 : i32
    return %c0_i32, %c0_i32_0 : i32, i32
  }
  func.func @transform_5(%arg0: i32, %arg1: i32) -> (i32, i32) {
    %c0_i32 = arith.constant 0 : i32
    %c0_i32_0 = arith.constant 0 : i32
    %c0_i32_1 = arith.constant 0 : i32
    return %c0_i32, %c0_i32_0 : i32, i32
  }
  func.func @transform_6(%arg0: i32, %arg1: i32) -> (i32, i32) {
    %c0_i32 = arith.constant 0 : i32
    %c0_i32_0 = arith.constant 0 : i32
    %c0_i32_1 = arith.constant 0 : i32
    return %c0_i32, %c0_i32_0 : i32, i32
  }
  func.func @transform_7(%arg0: i32, %arg1: i32) -> (i32, i32) {
    %c0_i32 = arith.constant 0 : i32
    %c0_i32_0 = arith.constant 0 : i32
    %c0_i32_1 = arith.constant 0 : i32
    return %c0_i32, %c0_i32_0 : i32, i32
  }
  func.func @transform_8(%arg0: i32, %arg1: i32) -> (i32, i32) {
    %c0_i32 = arith.constant 0 : i32
    %c0_i32_0 = arith.constant 0 : i32
    %c0_i32_1 = arith.constant 0 : i32
    return %c0_i32, %c0_i32_0 : i32, i32
  }
  func.func @transform_9(%arg0: i32, %arg1: i32) -> (i32, i32, i32) {
    %c0_i32 = arith.constant 0 : i32
    %c0_i32_0 = arith.constant 0 : i32
    return %arg0, %c0_i32, %arg1 : i32, i32, i32
  }
}

</mosaic_0001>

<bundles_post_ra>
// kernel: custom-call.8
= control target key start
LH: loop header
LB: loop body
LE: loop exit
PB: predicated region body
PF: predicated region fallthrough
CT: control target
= control target key end

     0   :  { %s6_s0 = inlined_call_operand.vmem [shape: f32[2,16], index: 0, kind: output, shape index: {}]  }

// kernel: neg.1
= control target key start
LH: loop header
LB: loop body
LE: loop exit
PB: predicated region body
PF: predicated region fallthrough
CT: control target
= control target key end

     0   :  { %s40_s0 = inlined_call_operand.vmem [shape: f32[2,8,16], index: 0, kind: input, shape index: {}]   ;;  %s41_s1 = inlined_call_operand.vmem [shape: f32[2,8,16], index: 1, kind: output, shape index: {}]  }
   0x1   :  { %v2_v0 = vld [vmem:[%s40_s0] sm:$0xff]  ;;  %v16_v1 = vld [vmem:[%s40_s0 + $0x8] sm:$0xff] }
   0x2   :  { %v5_v2 = vxor.u32 2147483648, %v2_v0  ;;  %v12_v3 = vxor.u32 2147483648, %v16_v1 }
   0x4   :  { %7 = vst [vmem:[%s41_s1] sm:$0xff] %v5_v2  ;;  %17 = vst [vmem:[%s41_s1 + $0x8] sm:$0xff] %v12_v3 }

// kernel: pointweb_sa_forward.1
= control target key start
LH: loop header
LB: loop body
LE: loop exit
PB: predicated region body
PF: predicated region fallthrough
CT: control target
= control target key end

     0   :  { %s2554_s30 = smov 0   ;;  %s2556_s10 = smov 0   ;;  %s2922_s0 = inlined_call_operand.vmem [shape: bf16[2,8,8,8], index: 0, kind: input, shape index: {}]   ;;  %s2923_s1 = inlined_call_operand.vmem [shape: bf16[16,8], index: 1, kind: input, shape index: {}]   ;;  %s2924_s2 = inlined_call_operand.vmem [shape: f32[16,1], index: 2, kind: input, shape index: {}]   ;;  %s2925_s3 = inlined_call_operand.vmem [shape: bf16[8,16], index: 3, kind: input, shape index: {}]   ;;  %s2926_s4 = inlined_call_operand.vmem [shape: f32[8,1], index: 4, kind: input, shape index: {}]   ;;  %s2927_s5 = inlined_call_operand.vmem [shape: bf16[16,8], index: 5, kind: input, shape index: {}]   ;;  %s2928_s6 = inlined_call_operand.vmem [shape: f32[16,1], index: 6, kind: input, shape index: {}]   ;;  %s2929_s7 = inlined_call_operand.vmem [shape: bf16[32,16], index: 7, kind: input, shape index: {}]   ;;  %s2930_s8 = inlined_call_operand.vmem [shape: f32[32,1], index: 8, kind: input, shape index: {}]   ;;  %s2931_s9 = inlined_call_operand.vmem [shape: f32[2,32,8], index: 9, kind: output, shape index: {}]  }
   0x1   :  { %s2558_s11 = smov 0  }
   0x2 LB: > { %s31_s12 = sadd.s32 1, %s2495_s10  ;;  %p2120_p0 = scmp.ge.s32.totalorder %s2499_s11, 1  ;;  %s2499_s11 = sphi %s2558_s11, %s19_s11   ;;  %s2495_s10 = sphi %s2556_s10, %s2933_s10   ;;  %s2491_s30 = sphi %s2554_s30, %s2932_s30  }
   0x3   : > { %p33_p1 = scmp.ge.s32.totalorder %s31_s12, 2  ;;  %p306_p2 = scmp.lt.s32.totalorder %s2499_s11, 3 }
   0x5   : > { %s2935_s12 = smov (%p33_p1, %s31_s12), 0  ;;  %p307_p3 = pnand %p2120_p0, %p306_p2 }
   0x6   : > { %p348_p4 = scmp.lt.s32.totalorder (!%p307_p3), %s2491_s30, 1  ;;  %v2501_v0 = vmov (!%p307_p3), 0.0   ;;  %vm2502_vm0 = vmmov (!%p307_p3), 0   ;;  %v374_v1 = vld [vmem:[%s2924_s2] sm:$0xff] (!%p307_p3)  ;;  %v2503_v2 = vmov (!%p307_p3), 0   ;;  %vm403_vm1 = vcmask (!%p307_p3), 1043456  }
   0x7   : > { %310 = sbr.rel (%p307_p3) target bundleno = 4091 (0xffb), region = 56  ;;  %2252 = vmatprep.subr.bf16.mxu0 (!%p307_p3), %v2501_v0  ;;  %2254 = vmatprep.mubr.msk.bf16.mxu0 (!%p307_p3), %vm2502_vm0, %v2501_v0  ;;  %v375_v3 = vld [vmem:[%s2924_s2 + $0x8] sm:$0xff] (!%p307_p3)  ;;  %v2599_v6 = vld [vmem:[%s2923_s1] sm:$0xff] (!%p307_p3)   ;;  %vm399_vm2 = vcmask (!%p307_p3), 64512   ;;  %v382_v9 = vld [vmem:[%s2930_s8 + $0x18] sm:$0xff] (!%p307_p3)  ;;  %vm456_vm3 = vcmask (!%p307_p3), 130048  }
   0x8   : > { %2471 = vset.pattern.permute.xlu0 (!%p307_p3), %v2503_v2  ;;  %2258 = vmatprep.subr.bf16.mxu1 (!%p307_p3), %v2501_v0  ;;  %v378_v7 = vld [vmem:[%s2928_s6 + $0x8] sm:$0xff] (!%p307_p3)  ;;  %v376_v10 = vld [vmem:[%s2926_s4] sm:$0xff] (!%p307_p3)  ;;  %v381_v13 = vld [vmem:[%s2930_s8 + $0x10] sm:$0xff] (!%p307_p3) }
   0x9   : > { %386 = vperm.xlu0 (!%p307_p3), %2471, %v374_v1   ;;  %2260 = vmatprep.mubr.msk.bf16.mxu1 (!%p307_p3), %vm2502_vm0, %v2501_v0  ;;  %v380_v8 = vld [vmem:[%s2930_s8 + $0x8] sm:$0xff] (!%p307_p3)  ;;  %v377_v11 = vld [vmem:[%s2928_s6] sm:$0xff] (!%p307_p3) }
   0xa   : > { %2472 = vset.pattern.permute.xlu1 (!%p307_p3), %v2503_v2  ;;  %v379_v12 = vld [vmem:[%s2930_s8] sm:$0xff] (!%p307_p3)  ;;  %v2678_v54 = vld [vmem:[%s2929_s7 + $0x8] sm:$0xff] (!%p307_p3)  }
   0xb   : > { %453 = vperm.xlu1 (!%p307_p3), %2472, %v376_v10   ;;  %v2636_v25 = vld [vmem:[%s2925_s3] sm:$0xf] (!%p307_p3) }
   0xc   : > { %v2648_v37 = vld [vmem:[%s2927_s5] sm:$0xff] (!%p307_p3)  }
   0xd   : > { %391 = vperm.xlu0 (!%p307_p3), %2471, %v375_v3   ;;  %v2664_v39 = vld [vmem:[%s2929_s7] sm:$0xff] (!%p307_p3)  }
   0xe   : > { %s2937_s30 = smov (!%p348_p4, %s2491_s30), 1 }
   0xf   : > { %s2178_s15 = sshll.u32 %s2937_s30, 5  ;;  %505 = vperm.xlu1 %2472, %v377_v11  }
  0x10   : > { %s2592_s20 = scalar_lea.vmem %s2922_s0, %s2178_s15  ;;  %s363_s14 = scalar_lea.vmem %s2931_s9, %s2178_s15 }
  0x11   : > { %v383_v4 = vld [vmem:[%s2592_s20] sm:$0xf]  ;;  %510 = vperm.xlu0 %2471, %v378_v7   ;;  %v2134_v35 = vld [vmem:[%s2592_s20 + $0x4] sm:$0xf]  ;;  %v2692_v11 = vld [vmem:[%s2592_s20 + $0x8] sm:$0xf] }
  0x12   : > { %v405_v5 = vsel %vm403_vm1, %v383_v4, 0  ;;  %v500_v26 = vunpack.c.l.bf16 %v383_v4  ;;  %v660_v38 = vsel %vm403_vm1, %v2134_v35, 0  ;;  %v746_v2 = vunpack.c.l.bf16 %v2134_v35 }
  0x13   : > { %2253 = vmatpush3.bf16.msra.mxu0 %v405_v5  ;;  %570 = vperm.xlu1 %2472, %v379_v12  }
  0x14   : > { %2264 = vmatprep.subr.bf16.mxu0 %v2501_v0 }
  0x15   : > { %575 = vperm.xlu0 %2471, %v380_v8  }
  0x16   : > { %2255 = vmatmul.mubr.msk.bf16.vlgmr.msra.gmra.mrb[0].mxu0 %vm399_vm2, %v2599_v6 }
  0x17   : > { %2266 = vmatprep.mubr.msk.bf16.mxu0 %vm2502_vm0, %v2501_v0  ;;  %580 = vperm.xlu1 %2472, %v381_v13   ;;  %v856_v13 = vsel %vm403_vm1, %v2692_v11, 0 }
  0x19   : > { %585 = vperm.xlu0 %2471, %v382_v9  }
  0x88   : > { %v2627_v14 = vpop.permute.xlu0 %386 }
  0x8a   : > { %v2640_v27 = vpop.permute.xlu1 %453 }
  0x8c   : > { %v2630_v18 = vpop.permute.xlu0 %391 }
  0x8e   : > { %v2668_v40 = vpop.permute.xlu1 %505 }
  0x90   : > { %v2671_v44 = vpop.permute.xlu0 %510 }
  0xe9   : > { %v441_v15 = vpop.f32.mrb[0].mxu0 }
  0xea   : > { %v442_v16 = vadd.f32 %v441_v15, %v2627_v14  ;;  %v2256_v17 = vpop.f32.mrb[1].mxu0 }
  0xeb   : > { %v444_v19 = vpop.f32.mrb[2].mxu0 }
  0xec   : > { %v445_v20 = vadd.f32 %v444_v19, %v2630_v18  ;;  %v2257_v21 = vpop.f32.mrb[3].mxu0  ;;  %v448_v22 = vmax.f32 %v442_v16, 0.0 }
  0xee   : > { %v449_v23 = vmax.f32 %v445_v20, 0.0 }
  0xf0   : > { %v450_v24 = vpack.c.bf16 %v449_v23, %v448_v22 }
  0xf2   : > { %2259 = vmatpush3.bf16.msra.mxu1 %v450_v24 }
  0xf5   : > { %2261 = vmatmul.mubr.msk.bf16.vlgmr.msra.gmra.mrb[0].mxu1 %vm456_vm3, %v2636_v25 }
  0xf6   : > { %2272 = vmatprep.mubr.msk.bf16.mxu1 %vm456_vm3, %v2664_v39 }
 0x1c8   : > { %v494_v28 = vpop.f32.mrb[0].mxu1 }
 0x1c9   : > { %v495_v29 = vadd.f32 %v494_v28, %v2640_v27  ;;  %v2262_v30 = vpop.f32.mrb[1].mxu1 }
 0x1ca   : > { %v497_v31 = vpop.f32.mrb[2].mxu1 }
 0x1cb   : > { %v501_v32 = vadd.f32 %v500_v26, %v495_v29  ;;  %v2263_v33 = vpop.f32.mrb[3].mxu1 }
 0x1cd   : > { %v502_v34 = vpack.c.bf16 %v501_v32, %v501_v32 }
 0x1cf   : > { %v522_v36 = vsel %vm403_vm1, %v502_v34, 0 }
 0x1d0   : > { %2265 = vmatpush3.bf16.msra.mxu0 %v522_v36  ;;  %v2720_v36 = vpop.permute.xlu1 %570 }
 0x1d1   : > { %2276 = vmatprep.subr.bf16.mxu0 %v2501_v0 }
 0x1d3   : > { %2267 = vmatmul.mubr.msk.bf16.vlgmr.msra.gmra.mrb[4].mxu0 %vm399_vm2, %v2648_v37 }
 0x1d4   : > { %2277 = vmatpush3.bf16.msra.mxu0 %v660_v38  ;;  %2278 = vmatprep.mubr.msk.bf16.mxu0 %vm2502_vm0, %v2501_v0  ;;  %v2722_v38 = vpop.permute.xlu0 %575 }
 0x1d5   : > { %2288 = vmatprep.subr.bf16.mxu0 %v2501_v0 }
 0x1db   : > { %2279 = vmatmul.mubr.msk.bf16.vlgmr.msra.gmra.mrb[8].mxu0 %vm399_vm2, %v2599_v6 }
 0x1dc   : > { %2290 = vmatprep.mubr.msk.bf16.mxu0 %vm2502_vm0, %v2501_v0 }
 0x2a6   : > { %v558_v41 = vpop.f32.mrb[4].mxu0 }
 0x2a7   : > { %v559_v42 = vadd.f32 %v558_v41, %v2668_v40  ;;  %v2268_v43 = vpop.f32.mrb[5].mxu0  ;;  %v2724_v41 = vpop.permute.xlu1 %580 }
 0x2a8   : > { %v561_v45 = vpop.f32.mrb[6].mxu0  ;;  %v2727_v43 = vpop.permute.xlu0 %585 }
 0x2a9   : > { %v562_v46 = vadd.f32 %v561_v45, %v2671_v44  ;;  %v2269_v47 = vpop.f32.mrb[7].mxu0  ;;  %v565_v48 = vmax.f32 %v559_v42, 0.0 }
 0x2ab   : > { %v566_v49 = vmax.f32 %v562_v46, 0.0 }
 0x2ad   : > { %v567_v50 = vpack.c.bf16 %v566_v49, %v565_v48 }
 0x2ae   : > { %v696_v51 = vpop.f32.mrb[8].mxu0 }
 0x2af   : > { %v697_v52 = vadd.f32 %v696_v51, %v2627_v14  ;;  %2270 = vmatprep.subr.bf16.mxu1 %v567_v50  ;;  %v2280_v53 = vpop.f32.mrb[9].mxu0 }
 0x2b0   : > { %2271 = vmatpush3.bf16.msra.mxu1 %v567_v50  ;;  %v699_v55 = vpop.f32.mrb[10].mxu0 }
 0x2b1   : > { %v700_v56 = vadd.f32 %v699_v55, %v2630_v18  ;;  %v2281_v57 = vpop.f32.mrb[11].mxu0  ;;  %2282 = vmatprep.subr.bf16.mxu1 %v2501_v0  ;;  %v703_v58 = vmax.f32 %v697_v52, 0.0 }
 0x2b3   : > { %v704_v59 = vmax.f32 %v700_v56, 0.0  ;;  %2273 = vmatmul.mubr.msk.bf16.vlgmr.msra.gmra.mrb[4].mxu1 %vm456_vm3, %v2678_v54 }
 0x2b4   : > { %2284 = vmatprep.mubr.msk.bf16.mxu1 %vm2502_vm0, %v2501_v0 }
 0x2b5   : > { %v705_v60 = vpack.c.bf16 %v704_v59, %v703_v58 }
 0x2b7   : > { %2283 = vmatpush3.bf16.msra.mxu1 %v705_v60 }
 0x2bb   : > { %2285 = vmatmul.mubr.msk.bf16.vlgmr.msra.gmra.mrb[8].mxu1 %vm456_vm3, %v2636_v25 }
 0x2bc   : > { %2296 = vmatprep.mubr.msk.bf16.mxu1 %vm456_vm3, %v2664_v39 }
 0x386   : > { %v2274_v61 = vpop.f32.mrb[4].mxu1 }
 0x387   : > { %v638_v62 = vpop.f32.mrb[5].mxu1  ;;  %v647_v42 = vadd.f32 %v2274_v61, %v2724_v41 }
 0x388   : > { %v2275_v63 = vpop.f32.mrb[6].mxu1  ;;  %v639_v45 = vadd.f32 %v638_v62, %v2720_v36 }
 0x389   : > { %v641_v1 = vpop.f32.mrb[7].mxu1  ;;  %v650_v47 = vadd.f32 %v2275_v63, %v2727_v43  ;;  %v655_v53 = vmax.f32 %v647_v42, 0.0 }
 0x38a   : > { %v642_v50 = vadd.f32 %v641_v1, %v2722_v38  ;;  %v653_v58 = vmax.f32 %v639_v45, 0.0 }
 0x38b   : > { %v656_v61 = vmax.f32 %v650_v47, 0.0 }
 0x38e   : > { %v740_v3 = vpop.f32.mrb[8].mxu1 }
 0x38f   : > { %v741_v4 = vadd.f32 %v740_v3, %v2640_v27  ;;  %v2286_v5 = vpop.f32.mrb[9].mxu1 }
 0x390   : > { %v743_v7 = vpop.f32.mrb[10].mxu1  ;;  %v942_v5 = vunpack.c.l.bf16 %v2692_v11 }
 0x391   : > { %v747_v8 = vadd.f32 %v746_v2, %v741_v4  ;;  %v2287_v9 = vpop.f32.mrb[11].mxu1  ;;  %v654_v2 = vmax.f32 %v642_v50, 0.0 }
 0x393   : > { %v748_v10 = vpack.c.bf16 %v747_v8, %v747_v8 }
 0x395   : > { %v750_v12 = vsel %vm403_vm1, %v748_v10, 0 }
 0x396   : > { %2289 = vmatpush3.bf16.msra.mxu0 %v750_v12 }
 0x397   : > { %2300 = vmatprep.subr.bf16.mxu0 %v2501_v0 }
 0x399   : > { %2291 = vmatmul.mubr.msk.bf16.vlgmr.msra.gmra.mrb[12].mxu0 %vm399_vm2, %v2648_v37 }
 0x39a   : > { %2301 = vmatpush3.bf16.msra.mxu0 %v856_v13  ;;  %2302 = vmatprep.mubr.msk.bf16.mxu0 %vm2502_vm0, %v2501_v0 }
 0x39b   : > { %2312 = vmatprep.subr.bf16.mxu0 %v2501_v0 }
 0x3a1   : > { %2303 = vmatmul.mubr.msk.bf16.vlgmr.msra.gmra.mrb[16].mxu0 %vm399_vm2, %v2599_v6 }
 0x3a2   : > { %2314 = vmatprep.mubr.msk.bf16.mxu0 %vm2502_vm0, %v2501_v0 }
 0x46c   : > { %v786_v15 = vpop.f32.mrb[12].mxu0 }
 0x46d   : > { %v787_v16 = vadd.f32 %v786_v15, %v2668_v40  ;;  %v2292_v17 = vpop.f32.mrb[13].mxu0 }
 0x46e   : > { %v789_v19 = vpop.f32.mrb[14].mxu0  ;;  %v2146_v17 = vld [vmem:[%s2592_s20 + $0xc] sm:$0xf] }
 0x46f   : > { %v790_v20 = vadd.f32 %v789_v19, %v2671_v44  ;;  %v2293_v21 = vpop.f32.mrb[15].mxu0  ;;  %v793_v22 = vmax.f32 %v787_v16, 0.0 }
 0x471   : > { %v794_v23 = vmax.f32 %v790_v20, 0.0  ;;  %v1052_v20 = vsel %vm403_vm1, %v2146_v17, 0 }
 0x473   : > { %v795_v24 = vpack.c.bf16 %v794_v23, %v793_v22 }
 0x474   : > { %v892_v26 = vpop.f32.mrb[16].mxu0 }
 0x475   : > { %v893_v28 = vadd.f32 %v892_v26, %v2627_v14  ;;  %2294 = vmatprep.subr.bf16.mxu1 %v795_v24  ;;  %v2304_v29 = vpop.f32.mrb[17].mxu0 }
 0x476   : > { %2295 = vmatpush3.bf16.msra.mxu1 %v795_v24  ;;  %v895_v30 = vpop.f32.mrb[18].mxu0 }
 0x477   : > { %v896_v31 = vadd.f32 %v895_v30, %v2630_v18  ;;  %v2305_v32 = vpop.f32.mrb[19].mxu0  ;;  %2306 = vmatprep.subr.bf16.mxu1 %v2501_v0  ;;  %v899_v33 = vmax.f32 %v893_v28, 0.0 }
 0x479   : > { %v900_v34 = vmax.f32 %v896_v31, 0.0  ;;  %2297 = vmatmul.mubr.msk.bf16.vlgmr.msra.gmra.mrb[12].mxu1 %vm456_vm3, %v2678_v54 }
 0x47a   : > { %2308 = vmatprep.mubr.msk.bf16.mxu1 %vm2502_vm0, %v2501_v0 }
 0x47b   : > { %v901_v35 = vpack.c.bf16 %v900_v34, %v899_v33 }
 0x47d   : > { %2307 = vmatpush3.bf16.msra.mxu1 %v901_v35 }
 0x481   : > { %2309 = vmatmul.mubr.msk.bf16.vlgmr.msra.gmra.mrb[16].mxu1 %vm456_vm3, %v2636_v25 }
 0x482   : > { %2320 = vmatprep.mubr.msk.bf16.mxu1 %vm456_vm3, %v2664_v39 }
 0x54c   : > { %v2298_v46 = vpop.f32.mrb[12].mxu1 }
 0x54d   : > { %v839_v48 = vadd.f32 %v2298_v46, %v2724_v41  ;;  %v830_v49 = vpop.f32.mrb[13].mxu1 }
 0x54e   : > { %v831_v51 = vadd.f32 %v830_v49, %v2720_v36  ;;  %v2299_v52 = vpop.f32.mrb[14].mxu1 }
 0x54f   : > { %v847_v55 = vmax.f32 %v839_v48, 0.0  ;;  %v842_v56 = vadd.f32 %v2299_v52, %v2727_v43  ;;  %v833_v57 = vpop.f32.mrb[15].mxu1 }
 0x550   : > { %v845_v59 = vmax.f32 %v831_v51, 0.0  ;;  %v834_v60 = vadd.f32 %v833_v57, %v2722_v38 }
 0x551   : > { %v851_v62 = vmax.f32 %v655_v53, %v847_v55  ;;  %v848_v63 = vmax.f32 %v842_v56, 0.0 }
 0x552   : > { %v849_v3 = vmax.f32 %v653_v58, %v845_v59  ;;  %v846_v4 = vmax.f32 %v834_v60, 0.0 }
 0x553   : > { %v852_v1 = vmax.f32 %v656_v61, %v848_v63 }
 0x554   : > { %v850_v7 = vmax.f32 %v654_v2, %v846_v4  ;;  %v936_v8 = vpop.f32.mrb[16].mxu1  ;;  %v1138_v4 = vunpack.c.l.bf16 %v2146_v17 }
 0x555   : > { %v937_v9 = vadd.f32 %v936_v8, %v2640_v27  ;;  %v2310_v10 = vpop.f32.mrb[17].mxu1 }
 0x556   : > { %v939_v12 = vpop.f32.mrb[18].mxu1 }
 0x557   : > { %v943_v13 = vadd.f32 %v942_v5, %v937_v9  ;;  %v2311_v15 = vpop.f32.mrb[19].mxu1 }
 0x559   : > { %v944_v16 = vpack.c.bf16 %v943_v13, %v943_v13 }
 0x55b   : > { %v946_v19 = vsel %vm403_vm1, %v944_v16, 0 }
 0x55c   : > { %2313 = vmatpush3.bf16.msra.mxu0 %v946_v19  ;;  %v2152_v19 = vld [vmem:[%s2592_s20 + $0x10] sm:$0xf] }
 0x55d   : > { %2324 = vmatprep.subr.bf16.mxu0 %v2501_v0 }
 0x55f   : > { %2315 = vmatmul.mubr.msk.bf16.vlgmr.msra.gmra.mrb[20].mxu0 %vm399_vm2, %v2648_v37 }
 0x560   : > { %2325 = vmatpush3.bf16.msra.mxu0 %v1052_v20  ;;  %2326 = vmatprep.mubr.msk.bf16.mxu0 %vm2502_vm0, %v2501_v0 }
 0x561   : > { %2336 = vmatprep.subr.bf16.mxu0 %v2501_v0 }
 0x567   : > { %2327 = vmatmul.mubr.msk.bf16.vlgmr.msra.gmra.mrb[24].mxu0 %vm399_vm2, %v2599_v6 }
 0x568   : > { %2338 = vmatprep.mubr.msk.bf16.mxu0 %vm2502_vm0, %v2501_v0 }
 0x632   : > { %v982_v11 = vpop.f32.mrb[20].mxu0 }
 0x633   : > { %v983_v21 = vadd.f32 %v982_v11, %v2668_v40  ;;  %v2316_v22 = vpop.f32.mrb[21].mxu0 }
 0x634   : > { %v985_v23 = vpop.f32.mrb[22].mxu0 }
 0x635   : > { %v986_v24 = vadd.f32 %v985_v23, %v2671_v44  ;;  %v2317_v26 = vpop.f32.mrb[23].mxu0  ;;  %v989_v28 = vmax.f32 %v983_v21, 0.0 }
 0x637   : > { %v990_v29 = vmax.f32 %v986_v24, 0.0 }
 0x639   : > { %v991_v30 = vpack.c.bf16 %v990_v29, %v989_v28 }
 0x63a   : > { %v1088_v31 = vpop.f32.mrb[24].mxu0 }
 0x63b   : > { %v1089_v32 = vadd.f32 %v1088_v31, %v2627_v14  ;;  %2318 = vmatprep.subr.bf16.mxu1 %v991_v30  ;;  %v2328_v33 = vpop.f32.mrb[25].mxu0 }
 0x63c   : > { %2319 = vmatpush3.bf16.msra.mxu1 %v991_v30  ;;  %v1091_v34 = vpop.f32.mrb[26].mxu0 }
 0x63d   : > { %v1092_v35 = vadd.f32 %v1091_v34, %v2630_v18  ;;  %v2329_v42 = vpop.f32.mrb[27].mxu0  ;;  %2330 = vmatprep.subr.bf16.mxu1 %v2501_v0  ;;  %v1095_v45 = vmax.f32 %v1089_v32, 0.0 }
 0x63f   : > { %v1096_v46 = vmax.f32 %v1092_v35, 0.0  ;;  %2321 = vmatmul.mubr.msk.bf16.vlgmr.msra.gmra.mrb[20].mxu1 %vm456_vm3, %v2678_v54 }
 0x640   : > { %2332 = vmatprep.mubr.msk.bf16.mxu1 %vm2502_vm0, %v2501_v0 }
 0x641   : > { %v1097_v47 = vpack.c.bf16 %v1096_v46, %v1095_v45 }
 0x643   : > { %2331 = vmatpush3.bf16.msra.mxu1 %v1097_v47 }
 0x647   : > { %2333 = vmatmul.mubr.msk.bf16.vlgmr.msra.gmra.mrb[24].mxu1 %vm456_vm3, %v2636_v25 }
 0x648   : > { %2344 = vmatprep.mubr.msk.bf16.mxu1 %vm456_vm3, %v2664_v39 }
 0x712   : > { %v2322_v48 = vpop.f32.mrb[20].mxu1 }
 0x713   : > { %v1035_v49 = vadd.f32 %v2322_v48, %v2724_v41  ;;  %v1026_v50 = vpop.f32.mrb[21].mxu1 }
 0x714   : > { %v1027_v51 = vadd.f32 %v1026_v50, %v2720_v36  ;;  %v2323_v52 = vpop.f32.mrb[22].mxu1 }
 0x715   : > { %v1043_v53 = vmax.f32 %v1035_v49, 0.0  ;;  %v1038_v55 = vadd.f32 %v2323_v52, %v2727_v43  ;;  %v1029_v56 = vpop.f32.mrb[23].mxu1 }
 0x716   : > { %v1041_v57 = vmax.f32 %v1027_v51, 0.0  ;;  %v1030_v58 = vadd.f32 %v1029_v56, %v2722_v38 }
 0x717   : > { %v1047_v59 = vmax.f32 %v851_v62, %v1043_v53  ;;  %v1044_v60 = vmax.f32 %v1038_v55, 0.0  ;;  %v1248_v62 = vsel %vm403_vm1, %v2152_v19, 0 }
 0x718   : > { %v1045_v61 = vmax.f32 %v849_v3, %v1041_v57  ;;  %v1042_v63 = vmax.f32 %v1030_v58, 0.0 }
 0x719   : > { %v1048_v2 = vmax.f32 %v852_v1, %v1044_v60 }
 0x71a   : > { %v1046_v5 = vmax.f32 %v850_v7, %v1042_v63  ;;  %v1132_v8 = vpop.f32.mrb[24].mxu1  ;;  %v1334_v63 = vunpack.c.l.bf16 %v2152_v19 }
 0x71b   : > { %v1133_v9 = vadd.f32 %v1132_v8, %v2640_v27  ;;  %v2334_v10 = vpop.f32.mrb[25].mxu1 }
 0x71c   : > { %v1135_v12 = vpop.f32.mrb[26].mxu1 }
 0x71d   : > { %v1139_v13 = vadd.f32 %v1138_v4, %v1133_v9  ;;  %v2335_v15 = vpop.f32.mrb[27].mxu1 }
 0x71f   : > { %v1140_v16 = vpack.c.bf16 %v1139_v13, %v1139_v13 }
 0x721   : > { %v1142_v20 = vsel %vm403_vm1, %v1140_v16, 0 }
 0x722   : > { %2337 = vmatpush3.bf16.msra.mxu0 %v1142_v20  ;;  %v2158_v20 = vld [vmem:[%s2592_s20 + $0x14] sm:$0xf] }
 0x723   : > { %2348 = vmatprep.subr.bf16.mxu0 %v2501_v0 }
 0x725   : > { %2339 = vmatmul.mubr.msk.bf16.vlgmr.msra.gmra.mrb[28].mxu0 %vm399_vm2, %v2648_v37 }
 0x726   : > { %2349 = vmatpush3.bf16.msra.mxu0 %v1248_v62  ;;  %2350 = vmatprep.mubr.msk.bf16.mxu0 %vm2502_vm0, %v2501_v0 }
 0x727   : > { %2360 = vmatprep.subr.bf16.mxu0 %v2501_v0 }
 0x72d   : > { %2351 = vmatmul.mubr.msk.bf16.vlgmr.msra.gmra.mrb[32].mxu0 %vm399_vm2, %v2599_v6 }
 0x72e   : > { %2362 = vmatprep.mubr.msk.bf16.mxu0 %vm2502_vm0, %v2501_v0 }
 0x7f8   : > { %v1178_v3 = vpop.f32.mrb[28].mxu0 }
 0x7f9   : > { %v1179_v1 = vadd.f32 %v1178_v3, %v2668_v40  ;;  %v2340_v7 = vpop.f32.mrb[29].mxu0 }
 0x7fa   : > { %v1181_v17 = vpop.f32.mrb[30].mxu0 }
 0x7fb   : > { %v1182_v11 = vadd.f32 %v1181_v17, %v2671_v44  ;;  %v2341_v21 = vpop.f32.mrb[31].mxu0  ;;  %v1185_v22 = vmax.f32 %v1179_v1, 0.0 }
 0x7fd   : > { %v1186_v23 = vmax.f32 %v1182_v11, 0.0 }
 0x7ff   : > { %v1187_v24 = vpack.c.bf16 %v1186_v23, %v1185_v22 }
 0x800   : > { %v1284_v26 = vpop.f32.mrb[32].mxu0 }
 0x801   : > { %v1285_v28 = vadd.f32 %v1284_v26, %v2627_v14  ;;  %2342 = vmatprep.subr.bf16.mxu1 %v1187_v24  ;;  %v2352_v29 = vpop.f32.mrb[33].mxu0 }
 0x802   : > { %2343 = vmatpush3.bf16.msra.mxu1 %v1187_v24  ;;  %v1287_v30 = vpop.f32.mrb[34].mxu0 }
 0x803   : > { %v1288_v31 = vadd.f32 %v1287_v30, %v2630_v18  ;;  %v2353_v32 = vpop.f32.mrb[35].mxu0  ;;  %2354 = vmatprep.subr.bf16.mxu1 %v2501_v0  ;;  %v1291_v33 = vmax.f32 %v1285_v28, 0.0 }
 0x805   : > { %v1292_v34 = vmax.f32 %v1288_v31, 0.0  ;;  %2345 = vmatmul.mubr.msk.bf16.vlgmr.msra.gmra.mrb[28].mxu1 %vm456_vm3, %v2678_v54 }
 0x806   : > { %2356 = vmatprep.mubr.msk.bf16.mxu1 %vm2502_vm0, %v2501_v0 }
 0x807   : > { %v1293_v35 = vpack.c.bf16 %v1292_v34, %v1291_v33 }
 0x809   : > { %2355 = vmatpush3.bf16.msra.mxu1 %v1293_v35 }
 0x80d   : > { %2357 = vmatmul.mubr.msk.bf16.vlgmr.msra.gmra.mrb[32].mxu1 %vm456_vm3, %v2636_v25 }
 0x80e   : > { %2368 = vmatprep.mubr.msk.bf16.mxu1 %vm456_vm3, %v2664_v39 }
 0x8d8   : > { %v2346_v42 = vpop.f32.mrb[28].mxu1 }
 0x8d9   : > { %v1231_v45 = vadd.f32 %v2346_v42, %v2724_v41  ;;  %v1222_v46 = vpop.f32.mrb[29].mxu1 }
 0x8da   : > { %v1223_v47 = vadd.f32 %v1222_v46, %v2720_v36  ;;  %v2347_v48 = vpop.f32.mrb[30].mxu1 }
 0x8db   : > { %v1239_v49 = vmax.f32 %v1231_v45, 0.0  ;;  %v1234_v50 = vadd.f32 %v2347_v48, %v2727_v43  ;;  %v1225_v51 = vpop.f32.mrb[31].mxu1 }
 0x8dc   : > { %v1237_v52 = vmax.f32 %v1223_v47, 0.0  ;;  %v1226_v53 = vadd.f32 %v1225_v51, %v2722_v38 }
 0x8dd   : > { %v1243_v55 = vmax.f32 %v1047_v59, %v1239_v49  ;;  %v1240_v56 = vmax.f32 %v1234_v50, 0.0  ;;  %v1444_v59 = vsel %vm403_vm1, %v2158_v20, 0 }
 0x8de   : > { %v1241_v57 = vmax.f32 %v1045_v61, %v1237_v52  ;;  %v1238_v58 = vmax.f32 %v1226_v53, 0.0 }
 0x8df   : > { %v1244_v60 = vmax.f32 %v1048_v2, %v1240_v56 }
 0x8e0   : > { %v1242_v4 = vmax.f32 %v1046_v5, %v1238_v58  ;;  %v1328_v8 = vpop.f32.mrb[32].mxu1  ;;  %v1530_v58 = vunpack.c.l.bf16 %v2158_v20 }
 0x8e1   : > { %v1329_v9 = vadd.f32 %v1328_v8, %v2640_v27  ;;  %v2358_v10 = vpop.f32.mrb[33].mxu1 }
 0x8e2   : > { %v1331_v12 = vpop.f32.mrb[34].mxu1 }
 0x8e3   : > { %v1335_v13 = vadd.f32 %v1334_v63, %v1329_v9  ;;  %v2359_v15 = vpop.f32.mrb[35].mxu1 }
 0x8e5   : > { %v1336_v16 = vpack.c.bf16 %v1335_v13, %v1335_v13 }
 0x8e7   : > { %v1338_v62 = vsel %vm403_vm1, %v1336_v16, 0 }
 0x8e8   : > { %2361 = vmatpush3.bf16.msra.mxu0 %v1338_v62  ;;  %v2164_v62 = vld [vmem:[%s2592_s20 + $0x18] sm:$0xf] }
 0x8e9   : > { %2372 = vmatprep.subr.bf16.mxu0 %v2501_v0 }
 0x8eb   : > { %2363 = vmatmul.mubr.msk.bf16.vlgmr.msra.gmra.mrb[36].mxu0 %vm399_vm2, %v2648_v37 }
 0x8ec   : > { %2373 = vmatpush3.bf16.msra.mxu0 %v1444_v59  ;;  %2374 = vmatprep.mubr.msk.bf16.mxu0 %vm2502_vm0, %v2501_v0 }
 0x8ed   : > { %2384 = vmatprep.subr.bf16.mxu0 %v2501_v0 }
 0x8f3   : > { %2375 = vmatmul.mubr.msk.bf16.vlgmr.msra.gmra.mrb[40].mxu0 %vm399_vm2, %v2599_v6 }
 0x8f4   : > { %2386 = vmatprep.mubr.msk.bf16.mxu0 %vm2502_vm0, %v2501_v0 }
 0x9be   : > { %v1374_v61 = vpop.f32.mrb[36].mxu0 }
 0x9bf   : > { %v1375_v2 = vadd.f32 %v1374_v61, %v2668_v40  ;;  %v2364_v5 = vpop.f32.mrb[37].mxu0 }
 0x9c0   : > { %v1377_v19 = vpop.f32.mrb[38].mxu0 }
 0x9c1   : > { %v1378_v3 = vadd.f32 %v1377_v19, %v2671_v44  ;;  %v2365_v1 = vpop.f32.mrb[39].mxu0  ;;  %v1381_v7 = vmax.f32 %v1375_v2, 0.0 }
 0x9c3   : > { %v1382_v17 = vmax.f32 %v1378_v3, 0.0 }
 0x9c5   : > { %v1383_v11 = vpack.c.bf16 %v1382_v17, %v1381_v7 }
 0x9c6   : > { %v1480_v21 = vpop.f32.mrb[40].mxu0 }
 0x9c7   : > { %v1481_v22 = vadd.f32 %v1480_v21, %v2627_v14  ;;  %2366 = vmatprep.subr.bf16.mxu1 %v1383_v11  ;;  %v2376_v23 = vpop.f32.mrb[41].mxu0 }
 0x9c8   : > { %2367 = vmatpush3.bf16.msra.mxu1 %v1383_v11  ;;  %v1483_v24 = vpop.f32.mrb[42].mxu0 }
 0x9c9   : > { %v1484_v26 = vadd.f32 %v1483_v24, %v2630_v18  ;;  %v2377_v28 = vpop.f32.mrb[43].mxu0  ;;  %2378 = vmatprep.subr.bf16.mxu1 %v2501_v0  ;;  %v1487_v29 = vmax.f32 %v1481_v22, 0.0 }
 0x9cb   : > { %v1488_v30 = vmax.f32 %v1484_v26, 0.0  ;;  %2369 = vmatmul.mubr.msk.bf16.vlgmr.msra.gmra.mrb[36].mxu1 %vm456_vm3, %v2678_v54 }
 0x9cc   : > { %2380 = vmatprep.mubr.msk.bf16.mxu1 %vm2502_vm0, %v2501_v0 }
 0x9cd   : > { %v1489_v31 = vpack.c.bf16 %v1488_v30, %v1487_v29 }
 0x9cf   : > { %2379 = vmatpush3.bf16.msra.mxu1 %v1489_v31 }
 0x9d3   : > { %2381 = vmatmul.mubr.msk.bf16.vlgmr.msra.gmra.mrb[40].mxu1 %vm456_vm3, %v2636_v25 }
 0x9d4   : > { %2392 = vmatprep.mubr.msk.bf16.mxu1 %vm456_vm3, %v2664_v39 }
 0xa9e   : > { %v2370_v32 = vpop.f32.mrb[36].mxu1 }
 0xa9f   : > { %v1427_v33 = vadd.f32 %v2370_v32, %v2724_v41  ;;  %v1418_v34 = vpop.f32.mrb[37].mxu1 }
 0xaa0   : > { %v1419_v35 = vadd.f32 %v1418_v34, %v2720_v36  ;;  %v2371_v42 = vpop.f32.mrb[38].mxu1 }
 0xaa1   : > { %v1435_v45 = vmax.f32 %v1427_v33, 0.0  ;;  %v1430_v46 = vadd.f32 %v2371_v42, %v2727_v43  ;;  %v1421_v47 = vpop.f32.mrb[39].mxu1 }
 0xaa2   : > { %v1433_v48 = vmax.f32 %v1419_v35, 0.0  ;;  %v1422_v49 = vadd.f32 %v1421_v47, %v2722_v38 }
 0xaa3   : > { %v1439_v50 = vmax.f32 %v1243_v55, %v1435_v45  ;;  %v1436_v51 = vmax.f32 %v1430_v46, 0.0  ;;  %v1640_v55 = vsel %vm403_vm1, %v2164_v62, 0 }
 0xaa4   : > { %v1437_v52 = vmax.f32 %v1241_v57, %v1433_v48  ;;  %v1434_v53 = vmax.f32 %v1422_v49, 0.0 }
 0xaa5   : > { %v1440_v56 = vmax.f32 %v1244_v60, %v1436_v51 }
 0xaa6   : > { %v1438_v63 = vmax.f32 %v1242_v4, %v1434_v53  ;;  %v1524_v8 = vpop.f32.mrb[40].mxu1  ;;  %v1726_v53 = vunpack.c.l.bf16 %v2164_v62 }
 0xaa7   : > { %v1525_v9 = vadd.f32 %v1524_v8, %v2640_v27  ;;  %v2382_v10 = vpop.f32.mrb[41].mxu1 }
 0xaa8   : > { %v1527_v12 = vpop.f32.mrb[42].mxu1 }
 0xaa9   : > { %v1531_v13 = vadd.f32 %v1530_v58, %v1525_v9  ;;  %v2383_v15 = vpop.f32.mrb[43].mxu1 }
 0xaab   : > { %v1532_v16 = vpack.c.bf16 %v1531_v13, %v1531_v13 }
 0xaad   : > { %v1534_v59 = vsel %vm403_vm1, %v1532_v16, 0 }
 0xaae   : > { %2385 = vmatpush3.bf16.msra.mxu0 %v1534_v59  ;;  %v2170_v59 = vld [vmem:[%s2592_s20 + $0x1c] sm:$0xf] }
 0xaaf   : > { %2396 = vmatprep.subr.bf16.mxu0 %v2501_v0 }
 0xab1   : > { %2387 = vmatmul.mubr.msk.bf16.vlgmr.msra.gmra.mrb[44].mxu0 %vm399_vm2, %v2648_v37 }
 0xab2   : > { %2397 = vmatpush3.bf16.msra.mxu0 %v1640_v55  ;;  %2398 = vmatprep.mubr.msk.bf16.mxu0 %vm2502_vm0, %v2501_v0 }
 0xab3   : > { %2408 = vmatprep.subr.bf16.mxu0 %v2501_v0 }
 0xab9   : > { %2399 = vmatmul.mubr.msk.bf16.vlgmr.msra.gmra.mrb[48].mxu0 %vm399_vm2, %v2599_v6 }
 0xaba   : > { %2410 = vmatprep.mubr.msk.bf16.mxu0 %vm2502_vm0, %v2501_v0 }
 0xb84   : > { %v1570_v57 = vpop.f32.mrb[44].mxu0 }
 0xb85   : > { %v1571_v60 = vadd.f32 %v1570_v57, %v2668_v40  ;;  %v2388_v4 = vpop.f32.mrb[45].mxu0 }
 0xb86   : > { %v1573_v20 = vpop.f32.mrb[46].mxu0 }
 0xb87   : > { %v1574_v61 = vadd.f32 %v1573_v20, %v2671_v44  ;;  %v2389_v2 = vpop.f32.mrb[47].mxu0  ;;  %v1577_v5 = vmax.f32 %v1571_v60, 0.0 }
 0xb89   : > { %v1578_v19 = vmax.f32 %v1574_v61, 0.0 }
 0xb8b   : > { %v1579_v3 = vpack.c.bf16 %v1578_v19, %v1577_v5 }
 0xb8c   : > { %v1676_v1 = vpop.f32.mrb[48].mxu0 }
 0xb8d   : > { %v1677_v7 = vadd.f32 %v1676_v1, %v2627_v14  ;;  %2390 = vmatprep.subr.bf16.mxu1 %v1579_v3  ;;  %v2400_v17 = vpop.f32.mrb[49].mxu0 }
 0xb8e   : > { %2391 = vmatpush3.bf16.msra.mxu1 %v1579_v3  ;;  %v1679_v11 = vpop.f32.mrb[50].mxu0 }
 0xb8f   : > { %v1680_v21 = vadd.f32 %v1679_v11, %v2630_v18  ;;  %v2401_v22 = vpop.f32.mrb[51].mxu0  ;;  %2402 = vmatprep.subr.bf16.mxu1 %v2501_v0  ;;  %v1683_v23 = vmax.f32 %v1677_v7, 0.0 }
 0xb91   : > { %v1684_v24 = vmax.f32 %v1680_v21, 0.0  ;;  %2393 = vmatmul.mubr.msk.bf16.vlgmr.msra.gmra.mrb[44].mxu1 %vm456_vm3, %v2678_v54 }
 0xb92   : > { %2404 = vmatprep.mubr.msk.bf16.mxu1 %vm2502_vm0, %v2501_v0 }
 0xb93   : > { %v1685_v26 = vpack.c.bf16 %v1684_v24, %v1683_v23 }
 0xb95   : > { %2403 = vmatpush3.bf16.msra.mxu1 %v1685_v26 }
 0xb99   : > { %2405 = vmatmul.mubr.msk.bf16.vlgmr.msra.gmra.mrb[48].mxu1 %vm456_vm3, %v2636_v25 }
 0xb9a   : > { %2416 = vmatprep.mubr.msk.bf16.mxu1 %vm456_vm3, %v2664_v39 }
 0xc64   : > { %v2394_v28 = vpop.f32.mrb[44].mxu1 }
 0xc65   : > { %v1623_v29 = vadd.f32 %v2394_v28, %v2724_v41  ;;  %v1614_v30 = vpop.f32.mrb[45].mxu1 }
 0xc66   : > { %v1615_v31 = vadd.f32 %v1614_v30, %v2720_v36  ;;  %v2395_v32 = vpop.f32.mrb[46].mxu1 }
 0xc67   : > { %v1631_v33 = vmax.f32 %v1623_v29, 0.0  ;;  %v1626_v34 = vadd.f32 %v2395_v32, %v2727_v43  ;;  %v1617_v35 = vpop.f32.mrb[47].mxu1 }
 0xc68   : > { %v1629_v42 = vmax.f32 %v1615_v31, 0.0  ;;  %v1618_v45 = vadd.f32 %v1617_v35, %v2722_v38 }
 0xc69   : > { %v1635_v46 = vmax.f32 %v1439_v50, %v1631_v33  ;;  %v1632_v47 = vmax.f32 %v1626_v34, 0.0  ;;  %v1836_v50 = vsel %vm403_vm1, %v2170_v59, 0 }
 0xc6a   : > { %v1633_v48 = vmax.f32 %v1437_v52, %v1629_v42  ;;  %v1630_v49 = vmax.f32 %v1618_v45, 0.0 }
 0xc6b   : > { %v1636_v51 = vmax.f32 %v1440_v56, %v1632_v47 }
 0xc6c   : > { %v1634_v58 = vmax.f32 %v1438_v63, %v1630_v49  ;;  %v1720_v8 = vpop.f32.mrb[48].mxu1 }
 0xc6d   : > { %v1721_v9 = vadd.f32 %v1720_v8, %v2640_v27  ;;  %v2406_v10 = vpop.f32.mrb[49].mxu1 }
 0xc6e   : > { %v1723_v12 = vpop.f32.mrb[50].mxu1 }
 0xc6f   : > { %v1727_v13 = vadd.f32 %v1726_v53, %v1721_v9  ;;  %v2407_v15 = vpop.f32.mrb[51].mxu1 }
 0xc71   : > { %v1728_v16 = vpack.c.bf16 %v1727_v13, %v1727_v13 }
 0xc73   : > { %v1730_v55 = vsel %vm403_vm1, %v1728_v16, 0 }
 0xc74   : > { %2409 = vmatpush3.bf16.msra.mxu0 %v1730_v55 }
 0xc75   : > { %2420 = vmatprep.subr.bf16.mxu0 %v2501_v0 }
 0xc77   : > { %2411 = vmatmul.mubr.msk.bf16.vlgmr.msra.gmra.mrb[52].mxu0 %vm399_vm2, %v2648_v37 }
 0xc78   : > { %2421 = vmatpush3.bf16.msra.mxu0 %v1836_v50  ;;  %2422 = vmatprep.mubr.msk.bf16.mxu0 %vm2502_vm0, %v2501_v0 }
 0xc79   : > { %2432 = vmatprep.subr.bf16.mxu0 %v2501_v0 }
 0xc7f   : > { %2423 = vmatmul.mubr.msk.bf16.vlgmr.msra.gmra.mrb[56].mxu0 %vm399_vm2, %v2599_v6 }
 0xc80   : > { %2434 = vmatprep.mubr.msk.bf16.mxu0 %vm2502_vm0, %v2501_v0 }
 0xd4a   : > { %v1766_v52 = vpop.f32.mrb[52].mxu0 }
 0xd4b   : > { %v1767_v56 = vadd.f32 %v1766_v52, %v2668_v40  ;;  %v2412_v63 = vpop.f32.mrb[53].mxu0 }
 0xd4c   : > { %v1769_v62 = vpop.f32.mrb[54].mxu0 }
 0xd4d   : > { %v1770_v57 = vadd.f32 %v1769_v62, %v2671_v44  ;;  %v2413_v60 = vpop.f32.mrb[55].mxu0  ;;  %v1773_v4 = vmax.f32 %v1767_v56, 0.0 }
 0xd4f   : > { %v1774_v20 = vmax.f32 %v1770_v57, 0.0 }
 0xd51   : > { %v1775_v61 = vpack.c.bf16 %v1774_v20, %v1773_v4 }
 0xd52   : > { %v1872_v2 = vpop.f32.mrb[56].mxu0 }
 0xd53   : > { %v1873_v5 = vadd.f32 %v1872_v2, %v2627_v14  ;;  %2414 = vmatprep.subr.bf16.mxu1 %v1775_v61  ;;  %v2424_v19 = vpop.f32.mrb[57].mxu0 }
 0xd54   : > { %2415 = vmatpush3.bf16.msra.mxu1 %v1775_v61  ;;  %v1875_v6 = vpop.f32.mrb[58].mxu0 }
 0xd55   : > { %v1876_v3 = vadd.f32 %v1875_v6, %v2630_v18  ;;  %v2425_v1 = vpop.f32.mrb[59].mxu0  ;;  %2426 = vmatprep.subr.bf16.mxu1 %v2501_v0  ;;  %v1879_v7 = vmax.f32 %v1873_v5, 0.0 }
 0xd57   : > { %v1880_v17 = vmax.f32 %v1876_v3, 0.0  ;;  %2417 = vmatmul.mubr.msk.bf16.vlgmr.msra.gmra.mrb[52].mxu1 %vm456_vm3, %v2678_v54 }
 0xd58   : > { %2428 = vmatprep.mubr.msk.bf16.mxu1 %vm2502_vm0, %v2501_v0 }
 0xd59   : > { %v1881_v11 = vpack.c.bf16 %v1880_v17, %v1879_v7 }
 0xd5b   : > { %2427 = vmatpush3.bf16.msra.mxu1 %v1881_v11 }
 0xd5f   : > { %2429 = vmatmul.mubr.msk.bf16.vlgmr.msra.gmra.mrb[56].mxu1 %vm456_vm3, %v2636_v25 }
 0xd60   : > { %2440 = vmatprep.mubr.msk.bf16.mxu1 %vm456_vm3, %v2664_v39  ;;  %v1922_v39 = vunpack.c.l.bf16 %v2170_v59 }
 0xe2a   : > { %v2418_v14 = vpop.f32.mrb[52].mxu1 }
 0xe2b   : > { %v1819_v18 = vadd.f32 %v2418_v14, %v2724_v41  ;;  %v1810_v21 = vpop.f32.mrb[53].mxu1 }
 0xe2c   : > { %v1811_v22 = vadd.f32 %v1810_v21, %v2720_v36  ;;  %v2419_v23 = vpop.f32.mrb[54].mxu1 }
 0xe2d   : > { %v1827_v24 = vmax.f32 %v1819_v18, 0.0  ;;  %v1822_v26 = vadd.f32 %v2419_v23, %v2727_v43  ;;  %v1813_v28 = vpop.f32.mrb[55].mxu1 }
 0xe2e   : > { %v1825_v0 = vmax.f32 %v1811_v22, 0.0  ;;  %v1814_v29 = vadd.f32 %v1813_v28, %v2722_v38 }
 0xe2f   : > { %v1831_v30 = vmax.f32 %v1635_v46, %v1827_v24  ;;  %v1828_v31 = vmax.f32 %v1822_v26, 0.0 }
 0xe30   : > { %v1829_v25 = vmax.f32 %v1633_v48, %v1825_v0  ;;  %v1826_v32 = vmax.f32 %v1814_v29, 0.0 }
 0xe31   : > { %v1832_v33 = vmax.f32 %v1636_v51, %v1828_v31 }
 0xe32   : > { %v1830_v34 = vmax.f32 %v1634_v58, %v1826_v32  ;;  %v1916_v35 = vpop.f32.mrb[56].mxu1 }
 0xe33   : > { %v1917_v42 = vadd.f32 %v1916_v35, %v2640_v27  ;;  %v2430_v45 = vpop.f32.mrb[57].mxu1 }
 0xe34   : > { %v1919_v47 = vpop.f32.mrb[58].mxu1 }
 0xe35   : > { %v1923_v49 = vadd.f32 %v1922_v39, %v1917_v42  ;;  %v2431_v53 = vpop.f32.mrb[59].mxu1 }
 0xe37   : > { %v1924_v8 = vpack.c.bf16 %v1923_v49, %v1923_v49 }
 0xe39   : > { %v1926_v9 = vsel %vm403_vm1, %v1924_v8, 0 }
 0xe3a   : > { %2433 = vmatpush3.bf16.msra.mxu0 %v1926_v9 }
 0xe3d   : > { %2435 = vmatmul.mubr.msk.bf16.vlgmr.msra.gmra.mrb[60].mxu0 %vm399_vm2, %v2648_v37 }
 0xf10   : > { %v1962_v46 = vpop.f32.mrb[60].mxu0 }
 0xf11   : > { %v1963_v48 = vadd.f32 %v1962_v46, %v2668_v40  ;;  %v2436_v51 = vpop.f32.mrb[61].mxu0 }
 0xf12   : > { %v1965_v10 = vpop.f32.mrb[62].mxu0 }
 0xf13   : > { %v1966_v58 = vadd.f32 %v1965_v10, %v2671_v44  ;;  %v2437_v27 = vpop.f32.mrb[63].mxu0  ;;  %v1969_v12 = vmax.f32 %v1963_v48, 0.0 }
 0xf15   : > { %v1970_v13 = vmax.f32 %v1966_v58, 0.0 }
 0xf17   : > { %v1971_v15 = vpack.c.bf16 %v1970_v13, %v1969_v12 }
 0xf19   : > { %2438 = vmatprep.subr.bf16.mxu1 %v1971_v15 }
 0xf1a   : > { %2439 = vmatpush3.bf16.msra.mxu1 %v1971_v15 }
 0xf1d   : > { %2441 = vmatmul.mubr.msk.bf16.vlgmr.msra.gmra.mrb[60].mxu1 %vm456_vm3, %v2678_v54 }
 0xff0   : > { %v2442_v16 = vpop.f32.mrb[60].mxu1 }
 0xff1   : > { %v2015_v37 = vadd.f32 %v2442_v16, %v2724_v41  ;;  %v2006_v59 = vpop.f32.mrb[61].mxu1 }
 0xff2   : > { %v2007_v40 = vadd.f32 %v2006_v59, %v2720_v36  ;;  %v2443_v55 = vpop.f32.mrb[62].mxu1 }
 0xff3   : > { %v2023_v50 = vmax.f32 %v2015_v37, 0.0  ;;  %v2018_v44 = vadd.f32 %v2443_v55, %v2727_v43  ;;  %v2009_v52 = vpop.f32.mrb[63].mxu1 }
 0xff4   : > { %v2021_v56 = vmax.f32 %v2007_v40, 0.0  ;;  %v2010_v63 = vadd.f32 %v2009_v52, %v2722_v38 }
 0xff5   : > { %v2027_v54 = vmax.f32 %v1831_v30, %v2023_v50  ;;  %v2024_v62 = vmax.f32 %v2018_v44, 0.0 }
 0xff6   : > { %v2025_v57 = vmax.f32 %v1829_v25, %v2021_v56  ;;  %v2022_v41 = vmax.f32 %v2010_v63, 0.0 }
 0xff7   : > { %2031 = vst.msk [vmem:[%s363_s14 + $0x10] sm:$0xff] %vm399_vm2, %v2027_v54  ;;  %v2028_v36 = vmax.f32 %v1832_v33, %v2024_v62 }
 0xff8   : > { %2029 = vst.msk [vmem:[%s363_s14] sm:$0xff] %vm399_vm2, %v2025_v57  ;;  %v2026_v60 = vmax.f32 %v1830_v34, %v2022_v41 }
 0xff9   : > { %2032 = vst.msk [vmem:[%s363_s14 + $0x18] sm:$0xff] %vm399_vm2, %v2028_v36 }
 0xffa   : > { %2030 = vst.msk [vmem:[%s363_s14 + $0x8] sm:$0xff] %vm399_vm2, %v2026_v60 }
 0xffb PF: > { %s19_s11 = sadd.s32 1, %s2499_s11   ;;  %s2932_s30 = smov %s2495_s10 }
 0xffc   : > { %p16_p5 = scmp.ge.s32.totalorder %s19_s11, 4   ;;  %s2933_s10 = smov %s2935_s12 }
 0xffe   :  { %18 = sbr.rel (!%p16_p5) target bundleno = 2 (0x2), region = 93 }

</bundles_post_ra>
